<compile_context>
chip_gen: v6e
topology: v6e:2x2x1
jax: 0.10.0
libtpu: 0.0.40
codegen_flags: <defaults>
</compile_context>

<pallas_src>
import functools

import jax
import jax.numpy as jnp
from jax.experimental import pallas as pl
from jax.experimental.pallas import tpu as pltpu

EPS = 1e-5        # PyTorch BatchNorm1d default eps
HIDDEN = 128      # model hidden width (in_dims / out_dims)
OUT_PAD = 128     # final layer's 2 outputs zero-padded to 128 lanes


def generator_kernel(z_ref, w0_ref, wstk_ref, vec_ref, out_ref, *, batch):
    """Whole-batch, single-shot forward pass.

    vec_ref rows (f32, (16,128)):
      0:                  b0
      3i-2, 3i-1, 3i:     b_i, gamma_i, beta_i   for layer i in {1,2,3}
      10:                 b4 (zero-padded to 128 lanes)
      11..15:             zero padding
    wstk_ref (4,128,128) bf16: [w1, w2, w3, w4_pad]
    """
    inv_b = 1.0 / float(batch)

    # linear0: (B, z_dim) @ (z_dim, 128) + b0
    act = jnp.dot(z_ref[...].astype(jnp.bfloat16), w0_ref[...],
                  preferred_element_type=jnp.float32) + vec_ref[0:1, :]

    # Three [linear -> BatchNorm1d (training-mode) -> ReLU] blocks; static unroll.
    for layer in (1, 2, 3):
        h = jnp.dot(act.astype(jnp.bfloat16), wstk_ref[layer - 1],
                    preferred_element_type=jnp.float32) \
            + vec_ref[3 * layer - 2:3 * layer - 1, :]
        mean = jnp.sum(h, axis=0, keepdims=True) * inv_b
        hc = h - mean
        var = jnp.sum(hc * hc, axis=0, keepdims=True) * inv_b   # biased, centered
        gamma = vec_ref[3 * layer - 1:3 * layer, :]
        beta = vec_ref[3 * layer:3 * layer + 1, :]
        act = jnp.maximum(hc * jax.lax.rsqrt(var + EPS) * gamma + beta,
                          0.0)                                   # ReLU (leaky_relu=False)

    # linear4: output lanes zero-padded to 128 for a lane-dense store.
    out_ref[...] = jnp.dot(act.astype(jnp.bfloat16), wstk_ref[3],
                           preferred_element_type=jnp.float32) + vec_ref[10:11, :]


def generator_forward(z, params):
    """z: (B, z_dim) f32.  Returns (B, 2) f32 (training-mode BatchNorm1d)."""
    B, z_dim = z.shape

    # bf16 weights (f32 accumulation happens on the MXU inside the kernel).
    w0 = params["w0"].astype(jnp.bfloat16)                                # (z_dim, 128)
    wstk = jnp.stack([params["w1"], params["w2"], params["w3"],
                      params["w4_pad"]]).astype(jnp.bfloat16)             # (4, 128, 128)

    # Eleven (1,128) vectors packed into one resident (16,128) f32 array.
    rows = [params["b0"],
            params["b1"], params["g1"], params["be1"],
            params["b2"], params["g2"], params["be2"],
            params["b3"], params["g3"], params["be3"],
            params["b4_pad"]]
    vec = jnp.concatenate(
        [r.reshape(1, HIDDEN) for r in rows]
        + [jnp.zeros((16 - len(rows), HIDDEN), jnp.float32)], axis=0)     # (16, 128)

    # ---- explicit VMEM budget (v7x: 64 MiB physical per TensorCore) ----
    f32b = 4
    act_bytes = B * HIDDEN * f32b
    weight_bytes = (z_dim * HIDDEN + 4 * HIDDEN * HIDDEN) * 2 + 16 * HIDDEN * f32b
    est = (B * z_dim * f32b          # z resident
           + B * OUT_PAD * f32b      # padded output resident
           + 6 * act_bytes           # live f32 activations + bf16 casts + temporaries
           + weight_bytes)
    vmem_limit = max(int(1.3 * est), 16 << 20)
    assert vmem_limit <= (56 << 20), (
        "batch too large for the resident single-shot path on v7x; "
        "see TODO(synk) about the tiled fallback")

    # Advisory cost hint so XLA overlaps neighbours with this small kernel.
    flops = 2 * B * HIDDEN * (z_dim + 4 * HIDDEN)
    bytes_accessed = (B * z_dim * f32b + B * OUT_PAD * f32b + weight_bytes)

    vmem = pltpu.MemorySpace.VMEM
    out_padded = pl.pallas_call(
        functools.partial(generator_kernel, batch=B),
        out_shape=jax.ShapeDtypeStruct((B, OUT_PAD), jnp.float32),
        in_specs=[
            pl.BlockSpec(memory_space=vmem),   # z, whole batch resident
            pl.BlockSpec(memory_space=vmem),   # w0
            pl.BlockSpec(memory_space=vmem),   # w1..w4 stack
            pl.BlockSpec(memory_space=vmem),   # packed bias / BN vectors
        ],
        out_specs=pl.BlockSpec(memory_space=vmem),
        compiler_params=pltpu.CompilerParams(vmem_limit_bytes=vmem_limit),
        cost_estimate=pl.CostEstimate(flops=flops,
                                      transcendentals=3 * HIDDEN,
                                      bytes_accessed=bytes_accessed),
    )(z, w0, wstk, vec)

    return out_padded[:, :2]


def make_params(key, z_dim=128, hidden=HIDDEN, out_dim=2):
    """Deterministic synthetic parameters (normal init, small scales)."""
    ks = jax.random.split(key, 16)
    nrm = jax.random.normal
    p = {}
    p["w0"] = 0.02 * nrm(ks[0], (z_dim, hidden), jnp.float32)
    p["b0"] = 0.01 * nrm(ks[1], (1, hidden), jnp.float32)
    for n, i in enumerate((1, 2, 3)):
        base = 2 + 4 * n
        p[f"w{i}"] = 0.02 * nrm(ks[base], (hidden, hidden), jnp.float32)
        p[f"b{i}"] = 0.01 * nrm(ks[base + 1], (1, hidden), jnp.float32)
        p[f"g{i}"] = 1.0 + 0.1 * nrm(ks[base + 2], (1, hidden), jnp.float32)   # BN gamma
        p[f"be{i}"] = 0.1 * nrm(ks[base + 3], (1, hidden), jnp.float32)        # BN beta
    w4 = 0.02 * nrm(ks[14], (hidden, out_dim), jnp.float32)
    b4 = 0.01 * nrm(ks[15], (1, out_dim), jnp.float32)
    p["w4"], p["b4"] = w4, b4
    # last layer zero-padded to 128 output lanes (extra columns contribute nothing)
    p["w4_pad"] = jnp.zeros((hidden, OUT_PAD), jnp.float32).at[:, :out_dim].set(w4)
    p["b4_pad"] = jnp.zeros((1, OUT_PAD), jnp.float32).at[:, :out_dim].set(b4)
    return p


def reference_forward_f32(z, p):
    """Plain-JAX f32 reference mirroring the PyTorch forward (training-mode BN)."""
    act = z @ p["w0"] + p["b0"]
    for i in (1, 2, 3):
        h = act @ p[f"w{i}"] + p[f"b{i}"]
        mean = jnp.mean(h, axis=0, keepdims=True)
        var = jnp.mean((h - mean) ** 2, axis=0, keepdims=True)   # biased variance
        act = jnp.maximum((h - mean) / jnp.sqrt(var + EPS) * p[f"g{i}"] + p[f"be{i}"], 0.0)
    return act @ p["w4"] + p["b4"]


def reference_forward_mixed(z, p):
    """Mirrors the kernel numerics: bf16 matmul operands, f32 accumulation & BN."""
    def mm(a, w):
        return jnp.dot(a.astype(jnp.bfloat16), w.astype(jnp.bfloat16),
                       preferred_element_type=jnp.float32)
    act = mm(z, p["w0"]) + p["b0"]
    for i in (1, 2, 3):
        h = mm(act, p[f"w{i}"]) + p[f"b{i}"]
        mean = jnp.mean(h, axis=0, keepdims=True)
        hc = h - mean
        var = jnp.mean(hc * hc, axis=0, keepdims=True)           # biased, centered
        act = jnp.maximum(hc * jax.lax.rsqrt(var + EPS) * p[f"g{i}"] + p[f"be{i}"], 0.0)
    return mm(act, p["w4"]) + p["b4"]


if __name__ == "__main__":
    key = jax.random.PRNGKey(0)
    kz, kp = jax.random.split(key)

    B, Z_DIM = 256, 128
    z = jax.random.normal(kz, (B, Z_DIM), jnp.float32)
    # `label` is only consumed by ConditionalBatchNorm (conditional_training=False),
    # so it is unused here — kept for interface parity with the PyTorch forward.
    label = jnp.zeros((B,), jnp.int32)

    params = make_params(kp, z_dim=Z_DIM)

    ref_mixed = reference_forward_mixed(z, params)
    ref_f32 = reference_forward_f32(z, params)

    out = jax.block_until_ready(generator_forward(z, params))
    assert out.shape == (B, 2), out.shape
    assert jnp.allclose(out, ref_mixed, atol=2e-3, rtol=2e-3), (
        float(jnp.max(jnp.abs(out - ref_mixed))))
    assert jnp.allclose(out, ref_f32, atol=5e-2, rtol=5e-2), (
        float(jnp.max(jnp.abs(out - ref_f32))))

    print("KERNEL_OK")
</pallas_src>

<mosaic_0001>
module attributes {stable_mosaic.version = 11 : i64} {
  func.func @generator_kernel(%arg0: memref<256x128xf32, #tpu.memory_space<vmem>>, %arg1: memref<128x128xbf16, #tpu.memory_space<vmem>>, %arg2: memref<4x128x128xbf16, #tpu.memory_space<vmem>>, %arg3: memref<16x128xf32, #tpu.memory_space<vmem>>, %arg4: memref<256x128xf32, #tpu.memory_space<vmem>>) attributes {dimension_semantics = [], scalar_prefetch = 0 : i64, scratch_operands = 0 : i64, tpu.core_type = #tpu.core_type<tc>} {
    %c0 = arith.constant 0 : index
    %c0_0 = arith.constant 0 : index
    %0 = vector.load %arg0[%c0, %c0_0] : memref<256x128xf32, #tpu.memory_space<vmem>>, vector<256x128xf32>
    %1 = arith.truncf %0 : vector<256x128xf32> to vector<256x128xbf16>
    %c0_1 = arith.constant 0 : index
    %c0_2 = arith.constant 0 : index
    %2 = vector.load %arg1[%c0_1, %c0_2] : memref<128x128xbf16, #tpu.memory_space<vmem>>, vector<128x128xbf16>
    %cst = arith.constant dense<0.000000e+00> : vector<256x128xf32>
    %3 = tpu.matmul %1, %2, %cst {dimension_numbers = #tpu.dot_dimension_numbers<[1], [0], [0], [1], [0, 0, 1, 1], [], []>} : vector<256x128xbf16>, vector<128x128xbf16>, vector<256x128xf32> -> vector<256x128xf32>
    %c0_3 = arith.constant 0 : index
    %c0_4 = arith.constant 0 : index
    %4 = vector.load %arg3[%c0_3, %c0_4] : memref<16x128xf32, #tpu.memory_space<vmem>>, vector<1x128xf32>
    %5 = vector.broadcast %4 : vector<1x128xf32> to vector<256x128xf32>
    %6 = arith.addf %3, %5 : vector<256x128xf32>
    %7 = arith.truncf %6 : vector<256x128xf32> to vector<256x128xbf16>
    %c0_5 = arith.constant 0 : index
    %c0_6 = arith.constant 0 : index
    %c0_7 = arith.constant 0 : index
    %8 = vector.load %arg2[%c0_5, %c0_6, %c0_7] : memref<4x128x128xbf16, #tpu.memory_space<vmem>>, vector<1x128x128xbf16>
    %9 = vector.shape_cast %8 : vector<1x128x128xbf16> to vector<128x128xbf16>
    %cst_8 = arith.constant dense<0.000000e+00> : vector<256x128xf32>
    %10 = tpu.matmul %7, %9, %cst_8 {dimension_numbers = #tpu.dot_dimension_numbers<[1], [0], [0], [1], [0, 0, 1, 1], [], []>} : vector<256x128xbf16>, vector<128x128xbf16>, vector<256x128xf32> -> vector<256x128xf32>
    %c1 = arith.constant 1 : index
    %c0_9 = arith.constant 0 : index
    %11 = vector.load %arg3[%c1, %c0_9] : memref<16x128xf32, #tpu.memory_space<vmem>>, vector<1x128xf32>
    %12 = vector.broadcast %11 : vector<1x128xf32> to vector<256x128xf32>
    %13 = arith.addf %10, %12 : vector<256x128xf32>
    %cst_10 = arith.constant dense<0.000000e+00> : vector<128xf32>
    %14 = vector.multi_reduction <add>, %13, %cst_10 [0] : vector<256x128xf32> to vector<128xf32>
    %15 = vector.shape_cast %14 : vector<128xf32> to vector<1x128xf32>
    %cst_11 = arith.constant 3.906250e-03 : f32
    %16 = vector.broadcast %cst_11 : f32 to vector<1x128xf32>
    %17 = arith.mulf %15, %16 : vector<1x128xf32>
    %18 = vector.broadcast %17 : vector<1x128xf32> to vector<256x128xf32>
    %19 = arith.subf %13, %18 : vector<256x128xf32>
    %20 = arith.mulf %19, %19 : vector<256x128xf32>
    %cst_12 = arith.constant dense<0.000000e+00> : vector<128xf32>
    %21 = vector.multi_reduction <add>, %20, %cst_12 [0] : vector<256x128xf32> to vector<128xf32>
    %22 = vector.shape_cast %21 : vector<128xf32> to vector<1x128xf32>
    %cst_13 = arith.constant 3.906250e-03 : f32
    %23 = vector.broadcast %cst_13 : f32 to vector<1x128xf32>
    %24 = arith.mulf %22, %23 : vector<1x128xf32>
    %c2 = arith.constant 2 : index
    %c0_14 = arith.constant 0 : index
    %25 = vector.load %arg3[%c2, %c0_14] : memref<16x128xf32, #tpu.memory_space<vmem>>, vector<1x128xf32>
    %c3 = arith.constant 3 : index
    %c0_15 = arith.constant 0 : index
    %26 = vector.load %arg3[%c3, %c0_15] : memref<16x128xf32, #tpu.memory_space<vmem>>, vector<1x128xf32>
    %cst_16 = arith.constant 9.99999974E-6 : f32
    %27 = vector.broadcast %cst_16 : f32 to vector<1x128xf32>
    %28 = arith.addf %24, %27 : vector<1x128xf32>
    %29 = math.rsqrt %28 : vector<1x128xf32>
    %30 = vector.broadcast %29 : vector<1x128xf32> to vector<256x128xf32>
    %31 = arith.mulf %19, %30 : vector<256x128xf32>
    %32 = vector.broadcast %25 : vector<1x128xf32> to vector<256x128xf32>
    %33 = arith.mulf %31, %32 : vector<256x128xf32>
    %34 = vector.broadcast %26 : vector<1x128xf32> to vector<256x128xf32>
    %35 = arith.addf %33, %34 : vector<256x128xf32>
    %cst_17 = arith.constant 0.000000e+00 : f32
    %36 = vector.broadcast %cst_17 : f32 to vector<256x128xf32>
    %37 = arith.maximumf %35, %36 : vector<256x128xf32>
    %38 = arith.truncf %37 : vector<256x128xf32> to vector<256x128xbf16>
    %c1_18 = arith.constant 1 : index
    %c0_19 = arith.constant 0 : index
    %c0_20 = arith.constant 0 : index
    %39 = vector.load %arg2[%c1_18, %c0_19, %c0_20] : memref<4x128x128xbf16, #tpu.memory_space<vmem>>, vector<1x128x128xbf16>
    %40 = vector.shape_cast %39 : vector<1x128x128xbf16> to vector<128x128xbf16>
    %cst_21 = arith.constant dense<0.000000e+00> : vector<256x128xf32>
    %41 = tpu.matmul %38, %40, %cst_21 {dimension_numbers = #tpu.dot_dimension_numbers<[1], [0], [0], [1], [0, 0, 1, 1], [], []>} : vector<256x128xbf16>, vector<128x128xbf16>, vector<256x128xf32> -> vector<256x128xf32>
    %c4 = arith.constant 4 : index
    %c0_22 = arith.constant 0 : index
    %42 = vector.load %arg3[%c4, %c0_22] : memref<16x128xf32, #tpu.memory_space<vmem>>, vector<1x128xf32>
    %43 = vector.broadcast %42 : vector<1x128xf32> to vector<256x128xf32>
    %44 = arith.addf %41, %43 : vector<256x128xf32>
    %cst_23 = arith.constant dense<0.000000e+00> : vector<128xf32>
    %45 = vector.multi_reduction <add>, %44, %cst_23 [0] : vector<256x128xf32> to vector<128xf32>
    %46 = vector.shape_cast %45 : vector<128xf32> to vector<1x128xf32>
    %cst_24 = arith.constant 3.906250e-03 : f32
    %47 = vector.broadcast %cst_24 : f32 to vector<1x128xf32>
    %48 = arith.mulf %46, %47 : vector<1x128xf32>
    %49 = vector.broadcast %48 : vector<1x128xf32> to vector<256x128xf32>
    %50 = arith.subf %44, %49 : vector<256x128xf32>
    %51 = arith.mulf %50, %50 : vector<256x128xf32>
    %cst_25 = arith.constant dense<0.000000e+00> : vector<128xf32>
    %52 = vector.multi_reduction <add>, %51, %cst_25 [0] : vector<256x128xf32> to vector<128xf32>
    %53 = vector.shape_cast %52 : vector<128xf32> to vector<1x128xf32>
    %cst_26 = arith.constant 3.906250e-03 : f32
    %54 = vector.broadcast %cst_26 : f32 to vector<1x128xf32>
    %55 = arith.mulf %53, %54 : vector<1x128xf32>
    %c5 = arith.constant 5 : index
    %c0_27 = arith.constant 0 : index
    %56 = vector.load %arg3[%c5, %c0_27] : memref<16x128xf32, #tpu.memory_space<vmem>>, vector<1x128xf32>
    %c6 = arith.constant 6 : index
    %c0_28 = arith.constant 0 : index
    %57 = vector.load %arg3[%c6, %c0_28] : memref<16x128xf32, #tpu.memory_space<vmem>>, vector<1x128xf32>
    %cst_29 = arith.constant 9.99999974E-6 : f32
    %58 = vector.broadcast %cst_29 : f32 to vector<1x128xf32>
    %59 = arith.addf %55, %58 : vector<1x128xf32>
    %60 = math.rsqrt %59 : vector<1x128xf32>
    %61 = vector.broadcast %60 : vector<1x128xf32> to vector<256x128xf32>
    %62 = arith.mulf %50, %61 : vector<256x128xf32>
    %63 = vector.broadcast %56 : vector<1x128xf32> to vector<256x128xf32>
    %64 = arith.mulf %62, %63 : vector<256x128xf32>
    %65 = vector.broadcast %57 : vector<1x128xf32> to vector<256x128xf32>
    %66 = arith.addf %64, %65 : vector<256x128xf32>
    %cst_30 = arith.constant 0.000000e+00 : f32
    %67 = vector.broadcast %cst_30 : f32 to vector<256x128xf32>
    %68 = arith.maximumf %66, %67 : vector<256x128xf32>
    %69 = arith.truncf %68 : vector<256x128xf32> to vector<256x128xbf16>
    %c2_31 = arith.constant 2 : index
    %c0_32 = arith.constant 0 : index
    %c0_33 = arith.constant 0 : index
    %70 = vector.load %arg2[%c2_31, %c0_32, %c0_33] : memref<4x128x128xbf16, #tpu.memory_space<vmem>>, vector<1x128x128xbf16>
    %71 = vector.shape_cast %70 : vector<1x128x128xbf16> to vector<128x128xbf16>
    %cst_34 = arith.constant dense<0.000000e+00> : vector<256x128xf32>
    %72 = tpu.matmul %69, %71, %cst_34 {dimension_numbers = #tpu.dot_dimension_numbers<[1], [0], [0], [1], [0, 0, 1, 1], [], []>} : vector<256x128xbf16>, vector<128x128xbf16>, vector<256x128xf32> -> vector<256x128xf32>
    %c7 = arith.constant 7 : index
    %c0_35 = arith.constant 0 : index
    %73 = vector.load %arg3[%c7, %c0_35] : memref<16x128xf32, #tpu.memory_space<vmem>>, vector<1x128xf32>
    %74 = vector.broadcast %73 : vector<1x128xf32> to vector<256x128xf32>
    %75 = arith.addf %72, %74 : vector<256x128xf32>
    %cst_36 = arith.constant dense<0.000000e+00> : vector<128xf32>
    %76 = vector.multi_reduction <add>, %75, %cst_36 [0] : vector<256x128xf32> to vector<128xf32>
    %77 = vector.shape_cast %76 : vector<128xf32> to vector<1x128xf32>
    %cst_37 = arith.constant 3.906250e-03 : f32
    %78 = vector.broadcast %cst_37 : f32 to vector<1x128xf32>
    %79 = arith.mulf %77, %78 : vector<1x128xf32>
    %80 = vector.broadcast %79 : vector<1x128xf32> to vector<256x128xf32>
    %81 = arith.subf %75, %80 : vector<256x128xf32>
    %82 = arith.mulf %81, %81 : vector<256x128xf32>
    %cst_38 = arith.constant dense<0.000000e+00> : vector<128xf32>
    %83 = vector.multi_reduction <add>, %82, %cst_38 [0] : vector<256x128xf32> to vector<128xf32>
    %84 = vector.shape_cast %83 : vector<128xf32> to vector<1x128xf32>
    %cst_39 = arith.constant 3.906250e-03 : f32
    %85 = vector.broadcast %cst_39 : f32 to vector<1x128xf32>
    %86 = arith.mulf %84, %85 : vector<1x128xf32>
    %c8 = arith.constant 8 : index
    %c0_40 = arith.constant 0 : index
    %87 = vector.load %arg3[%c8, %c0_40] : memref<16x128xf32, #tpu.memory_space<vmem>>, vector<1x128xf32>
    %c9 = arith.constant 9 : index
    %c0_41 = arith.constant 0 : index
    %88 = vector.load %arg3[%c9, %c0_41] : memref<16x128xf32, #tpu.memory_space<vmem>>, vector<1x128xf32>
    %cst_42 = arith.constant 9.99999974E-6 : f32
    %89 = vector.broadcast %cst_42 : f32 to vector<1x128xf32>
    %90 = arith.addf %86, %89 : vector<1x128xf32>
    %91 = math.rsqrt %90 : vector<1x128xf32>
    %92 = vector.broadcast %91 : vector<1x128xf32> to vector<256x128xf32>
    %93 = arith.mulf %81, %92 : vector<256x128xf32>
    %94 = vector.broadcast %87 : vector<1x128xf32> to vector<256x128xf32>
    %95 = arith.mulf %93, %94 : vector<256x128xf32>
    %96 = vector.broadcast %88 : vector<1x128xf32> to vector<256x128xf32>
    %97 = arith.addf %95, %96 : vector<256x128xf32>
    %cst_43 = arith.constant 0.000000e+00 : f32
    %98 = vector.broadcast %cst_43 : f32 to vector<256x128xf32>
    %99 = arith.maximumf %97, %98 : vector<256x128xf32>
    %100 = arith.truncf %99 : vector<256x128xf32> to vector<256x128xbf16>
    %c3_44 = arith.constant 3 : index
    %c0_45 = arith.constant 0 : index
    %c0_46 = arith.constant 0 : index
    %101 = vector.load %arg2[%c3_44, %c0_45, %c0_46] : memref<4x128x128xbf16, #tpu.memory_space<vmem>>, vector<1x128x128xbf16>
    %102 = vector.shape_cast %101 : vector<1x128x128xbf16> to vector<128x128xbf16>
    %cst_47 = arith.constant dense<0.000000e+00> : vector<256x128xf32>
    %103 = tpu.matmul %100, %102, %cst_47 {dimension_numbers = #tpu.dot_dimension_numbers<[1], [0], [0], [1], [0, 0, 1, 1], [], []>} : vector<256x128xbf16>, vector<128x128xbf16>, vector<256x128xf32> -> vector<256x128xf32>
    %c10 = arith.constant 10 : index
    %c0_48 = arith.constant 0 : index
    %104 = vector.load %arg3[%c10, %c0_48] : memref<16x128xf32, #tpu.memory_space<vmem>>, vector<1x128xf32>
    %105 = vector.broadcast %104 : vector<1x128xf32> to vector<256x128xf32>
    %106 = arith.addf %103, %105 : vector<256x128xf32>
    %c0_49 = arith.constant 0 : index
    %c0_50 = arith.constant 0 : index
    %107 = vector.load %arg4[%c0_49, %c0_50] : memref<256x128xf32, #tpu.memory_space<vmem>>, vector<256x128xf32>
    tpu.vector_store %arg4[%c0_49, %c0_50], %106 {strides = array<i32>} : memref<256x128xf32, #tpu.memory_space<vmem>>, vector<256x128xf32>,
    return
  }
}

</mosaic_0001>

<bundles_post_ra>
// kernel: tpu_custom_call.1
= control target key start
LH: loop header
LB: loop body
LE: loop exit
PB: predicated region body
PF: predicated region fallthrough
CT: control target
= control target key end

     0   :  { %9 = vsyncpa [#allocation3], 0  ;;  %s4329_s0 = inlined_call_operand.hbm [shape: f32[256,128], index: 0, kind: input, shape index: {}]   ;;  %s4330_s1 = inlined_call_operand.hbm [shape: bf16[128,128], index: 1, kind: input, shape index: {}]   ;;  %s4331_s2 = inlined_call_operand.hbm [shape: bf16[4,128,128], index: 2, kind: input, shape index: {}]   ;;  %s4332_s3 = inlined_call_operand.hbm [shape: f32[16,128], index: 3, kind: input, shape index: {}]   ;;  %s4333_s4 = inlined_call_operand.hbm [shape: f32[256,128], index: 4, kind: output, shape index: {}]  }
   0x1   :  { %10 = vsyncpa [#allocation6], 0 }
   0x2   :  { %11 = vsyncpa [#allocation9], 0 }
   0x3   :  { %12 = vsyncpa [#allocation4], 0  ;;  %s2820_s15 = smov [#allocation5]  }
   0x4   :  { %s30_s16 = sshll.u32 %s2820_s15, 4  ;;  %s31_s16 = int_to_ptr.vmem [resolvable:$true] %s30_s16 }
   0x5   :  { %s2720_s17 = scalar_lea.vmem %s31_s16, 1024  ;;  %p2725_p1 = scmp.lt.s32.totalorder %s31_s16, %s31_s16 }
   0x6   :  { %p2721_p0 = scmp.ne.s32.totalorder %s31_s16, %s2720_s17  ;;  %p2726_p2 = scmp.lt.s32.totalorder %s2720_s17, %s2720_s17 }
   0x8   :  { %p2727_p3 = por %p2726_p2, %p2725_p1 }
   0xa   :  { %p2728_p4 = pnand %p2727_p3, %p2721_p0 }
   0xc   :  { %2731 = shalt.err (!%p2728_p4)
}
   0xd   :  { %s2821_s18 = smov 64   ;;  %s2822_s19 = smov 4  }
   0xe   :  { %36 = dma.hbm_to_vmem [thread:$0]  %s4330_s1, 1024, %s31_s16, [#allocation6], %s2821_s18, %s2821_s18, %s2822_s19  }
   0xf   :  { %s2823_s22 = smov [#allocation2]  }
  0x10   :  { %s18_s23 = sshll.u32 %s2823_s22, 4  ;;  %s19_s23 = int_to_ptr.vmem [resolvable:$true] %s18_s23 }
  0x11   :  { %s2740_s24 = scalar_lea.vmem %s19_s23, 4096  ;;  %p2745_p6 = scmp.lt.s32.totalorder %s19_s23, %s19_s23 }
  0x12   :  { %p2741_p5 = scmp.ne.s32.totalorder %s19_s23, %s2740_s24  ;;  %p2746_p7 = scmp.lt.s32.totalorder %s2740_s24, %s2740_s24 }
  0x14   :  { %p2747_p8 = por %p2746_p7, %p2745_p6 }
  0x16   :  { %p2748_p9 = pnand %p2747_p8, %p2741_p5 }
  0x18   :  { %2751 = shalt.err (!%p2748_p9)
}
  0x19   :  { %s2824_s25 = smov 128   ;;  %s2825_s26 = smov 8  }
  0x1a   :  { %24 = dma.hbm_to_vmem [thread:$0]  %s4329_s0, 4096, %s19_s23, [#allocation3], %s2824_s25, %s2824_s25, %s2825_s26  }
  0x1b   :  { %s2826_s1 = smov [#allocation7]   ;;  %s2827_s30 = smov [#allocation8]  }
  0x1c   :  { %s42_s29 = sshll.u32 %s2826_s1, 4  ;;  %s54_s5 = sshll.u32 %s2827_s30, 4  ;;  %s43_s29 = int_to_ptr.vmem [resolvable:$true] %s42_s29  ;;  %s55_s5 = int_to_ptr.vmem [resolvable:$true] %s54_s5 }
  0x1d   :  { %s2760_s6 = scalar_lea.vmem %s43_s29, 4096  ;;  %p2765_p11 = scmp.lt.s32.totalorder %s43_s29, %s43_s29 }
  0x1e   :  { %p2761_p10 = scmp.ne.s32.totalorder %s43_s29, %s2760_s6  ;;  %p2766_p12 = scmp.lt.s32.totalorder %s2760_s6, %s2760_s6 }
  0x20   :  { %p2767_p13 = por %p2766_p12, %p2765_p11 }
  0x22   :  { %p2768_p0 = pnand %p2767_p13, %p2761_p10 }
  0x24   :  { %2771 = shalt.err (!%p2768_p0)
}
  0x25   :  { %48 = dma.hbm_to_vmem [thread:$0]  %s4331_s2, 4096, %s43_s29, [#allocation6], %s2821_s18, %s2821_s18, %s2822_s19  }
  0x26   :  { %s2780_s0 = scalar_lea.vmem %s55_s5, 256  ;;  %p2785_p2 = scmp.lt.s32.totalorder %s55_s5, %s55_s5 }
  0x27   :  { %p2781_p1 = scmp.ne.s32.totalorder %s55_s5, %s2780_s0  ;;  %p2786_p3 = scmp.lt.s32.totalorder %s2780_s0, %s2780_s0 }
  0x29   :  { %p2787_p4 = por %p2786_p3, %p2785_p2 }
  0x2b   :  { %p2788_p5 = pnand %p2787_p4, %p2781_p1 }
  0x2d   :  { %2791 = shalt.err (!%p2788_p5)
}
  0x2e   :  { %60 = dma.hbm_to_vmem [thread:$0]  %s4332_s3, 256, %s55_s5, [#allocation9], %s2824_s25, %s2824_s25, %s2825_s26  }
  0x2f   :  { %2812 = dma.done.wait [#allocation3], 4096  }
  0x30   :  { %2813 = vsyncadd [#allocation3], 4294963200 }
  0x31   :  { %2814 = dma.done.wait [#allocation6], 5120  }
  0x32   :  { %2815 = vsyncadd [#allocation6], 4294962176 }
  0x33   :  { %2816 = dma.done.wait [#allocation9], 256  }
  0x34   :  { %2817 = vsyncadd [#allocation9], 4294967040  ;;  %v2666_v0 = vld [vmem:[#allocation5 + $0x38] sm:$0xff]   ;;  %v2667_v1 = vld [vmem:[#allocation5 + $0x30] sm:$0xff]   ;;  %s2828_s2 = smov [#allocation10]  }
  0x35   :  { %2401 = vmatprep.subr.bf16.mxu0 %v2666_v0  ;;  %2641 = vmatprep.subr.bf16.mxu1 %v2666_v0  ;;  %v2668_v2 = vld [vmem:[#allocation5 + $0x28] sm:$0xff]   ;;  %v2669_v3 = vld [vmem:[#allocation5 + $0x20] sm:$0xff]   ;;  %v2670_v7 = vld [vmem:[#allocation5 + $0x18] sm:$0xff]   ;;  %s2216_s3 = sshll.u32 %s2828_s2, 4  ;;  %s2217_s3 = int_to_ptr.vmem [resolvable:$true] %s2216_s3 }
  0x36   :  { %2402 = vmatpush3.bf16.msra.mxu0 %v2666_v0  ;;  %2649 = vmatpush3.bf16.msra.mxu1 %v2666_v0  ;;  %v74_v4 = vld [vmem:[#allocation2] sm:$0xff]  ;;  %v75_v5 = vld [vmem:[#allocation2 + $0x8] sm:$0xff]  ;;  %v2671_v11 = vld [vmem:[#allocation5 + $0x10] sm:$0xff]   ;;  %s2792_s11 = scalar_lea.vmem %s2217_s3, 4096  ;;  %p2797_p7 = scmp.lt.s32.totalorder %s2217_s3, %s2217_s3 }
  0x37   :  { %2403 = vmatprep.subr.bf16.mxu0 %v2667_v1  ;;  %2642 = vmatprep.subr.bf16.mxu1 %v2667_v1  ;;  %v106_v6 = vpack.c.bf16 %v75_v5, %v74_v4  ;;  %v90_v8 = vld [vmem:[#allocation2 + $0x80] sm:$0xff]  ;;  %v91_v9 = vld [vmem:[#allocation2 + $0x88] sm:$0xff]  ;;  %v76_v14 = vld [vmem:[#allocation2 + $0x10] sm:$0xff]  ;;  %p2793_p6 = scmp.ne.s32.totalorder %s2217_s3, %s2792_s11  ;;  %p2798_p8 = scmp.lt.s32.totalorder %s2792_s11, %s2792_s11 }
  0x38   :  { %v114_v10 = vpack.c.bf16 %v91_v9, %v90_v8  ;;  %v2672_v12 = vld [vmem:[#allocation5 + $0x8] sm:$0xff]   ;;  %v2673_v13 = vld [vmem:[#allocation5] sm:$0xff]   ;;  %v77_v15 = vld [vmem:[#allocation2 + $0x18] sm:$0xff] }
  0x39   :  { %2417 = vmatprep.mubr.bf16.mxu0 %v106_v6  ;;  %v78_v16 = vld [vmem:[#allocation2 + $0x20] sm:$0xff]  ;;  %v79_v17 = vld [vmem:[#allocation2 + $0x28] sm:$0xff]  ;;  %v92_v18 = vld [vmem:[#allocation2 + $0x90] sm:$0xff]  ;;  %v107_v23 = vpack.c.bf16 %v77_v15, %v76_v14  ;;  %p2799_p9 = por %p2798_p8, %p2797_p7 }
  0x3a   :  { %2404 = vmatpush3.bf16.msra.mxu0 %v2667_v1  ;;  %2650 = vmatpush3.bf16.msra.mxu1 %v2667_v1  ;;  %v93_v19 = vld [vmem:[#allocation2 + $0x98] sm:$0xff]  ;;  %v94_v20 = vld [vmem:[#allocation2 + $0xa0] sm:$0xff]  ;;  %v95_v21 = vld [vmem:[#allocation2 + $0xa8] sm:$0xff]  ;;  %v108_v24 = vpack.c.bf16 %v79_v17, %v78_v16 }
  0x3b   :  { %2405 = vmatprep.subr.bf16.mxu0 %v2668_v2  ;;  %2643 = vmatprep.subr.bf16.mxu1 %v2668_v2  ;;  %v2674_v22 = vld [vmem:[#allocation7 + $0x38] sm:$0xff]   ;;  %v115_v25 = vpack.c.bf16 %v93_v19, %v92_v18  ;;  %v2675_v26 = vld [vmem:[#allocation7 + $0x30] sm:$0xff]   ;;  %v116_v27 = vpack.c.bf16 %v95_v21, %v94_v20  ;;  %v82_v30 = vld [vmem:[#allocation2 + $0x40] sm:$0xff]  ;;  %p2800_p10 = pnand %p2799_p9, %p2793_p6 }
  0x3c   :  { %2433 = vmatprep.mubr.bf16.mxu1 %v114_v10  ;;  %v80_v28 = vld [vmem:[#allocation2 + $0x30] sm:$0xff]  ;;  %v81_v29 = vld [vmem:[#allocation2 + $0x38] sm:$0xff]  ;;  %v83_v31 = vld [vmem:[#allocation2 + $0x48] sm:$0xff] }
  0x3d   :  { %v96_v32 = vld [vmem:[#allocation2 + $0xb0] sm:$0xff]  ;;  %v97_v33 = vld [vmem:[#allocation2 + $0xb8] sm:$0xff]  ;;  %v98_v34 = vld [vmem:[#allocation2 + $0xc0] sm:$0xff]  ;;  %v109_v37 = vpack.c.bf16 %v81_v29, %v80_v28  ;;  %v110_v38 = vpack.c.bf16 %v83_v31, %v82_v30 }
  0x3e   :  { %2406 = vmatpush3.bf16.msra.mxu0 %v2668_v2  ;;  %2651 = vmatpush3.bf16.msra.mxu1 %v2668_v2  ;;  %v99_v35 = vld [vmem:[#allocation2 + $0xc8] sm:$0xff]  ;;  %v117_v39 = vpack.c.bf16 %v97_v33, %v96_v32  ;;  %v2677_v40 = vld [vmem:[#allocation7 + $0x20] sm:$0xff]   ;;  %v84_v42 = vld [vmem:[#allocation2 + $0x50] sm:$0xff] }
  0x3f   :  { %2407 = vmatprep.subr.bf16.mxu0 %v2669_v3  ;;  %2644 = vmatprep.subr.bf16.mxu1 %v2669_v3  ;;  %v2676_v36 = vld [vmem:[#allocation7 + $0x28] sm:$0xff]   ;;  %v118_v41 = vpack.c.bf16 %v99_v35, %v98_v34  ;;  %v85_v43 = vld [vmem:[#allocation2 + $0x58] sm:$0xff]  ;;  %v86_v44 = vld [vmem:[#allocation2 + $0x60] sm:$0xff] }
  0x40   :  { %v87_v45 = vld [vmem:[#allocation2 + $0x68] sm:$0xff]  ;;  %v100_v46 = vld [vmem:[#allocation2 + $0xd0] sm:$0xff]  ;;  %v101_v47 = vld [vmem:[#allocation2 + $0xd8] sm:$0xff]  ;;  %v111_v51 = vpack.c.bf16 %v85_v43, %v84_v42 }
  0x41   :  { %v102_v48 = vld [vmem:[#allocation2 + $0xe0] sm:$0xff]  ;;  %v103_v49 = vld [vmem:[#allocation2 + $0xe8] sm:$0xff]  ;;  %v2678_v50 = vld [vmem:[#allocation7 + $0x18] sm:$0xff]   ;;  %v112_v52 = vpack.c.bf16 %v87_v45, %v86_v44  ;;  %v119_v53 = vpack.c.bf16 %v101_v47, %v100_v46 }
  0x42   :  { %2408 = vmatpush3.bf16.msra.mxu0 %v2669_v3  ;;  %2652 = vmatpush3.bf16.msra.mxu1 %v2669_v3  ;;  %v120_v54 = vpack.c.bf16 %v103_v49, %v102_v48  ;;  %v2679_v55 = vld [vmem:[#allocation7 + $0x10] sm:$0xff]   ;;  %v89_v57 = vld [vmem:[#allocation2 + $0x78] sm:$0xff]  ;;  %v2680_v62 = vld [vmem:[#allocation7 + $0x8] sm:$0xff]  }
  0x43   :  { %2409 = vmatprep.subr.bf16.mxu0 %v2670_v7  ;;  %2645 = vmatprep.subr.bf16.mxu1 %v2670_v7  ;;  %v88_v56 = vld [vmem:[#allocation2 + $0x70] sm:$0xff]  ;;  %v105_v59 = vld [vmem:[#allocation2 + $0xf8] sm:$0xff]  ;;  %v2681_v63 = vld [vmem:[#allocation7] sm:$0xff]  }
  0x44   :  { %v104_v58 = vld [vmem:[#allocation2 + $0xf0] sm:$0xff]  ;;  %v113_v60 = vpack.c.bf16 %v89_v57, %v88_v56  ;;  %v2880_v5 = vld [vmem:[#allocation8] ss:$0 sm:$0xff] }
  0x45   :  { %v121_v61 = vpack.c.bf16 %v105_v59, %v104_v58 }
  0x46   :  { %2410 = vmatpush3.bf16.msra.mxu0 %v2670_v7  ;;  %2653 = vmatpush3.bf16.msra.mxu1 %v2670_v7 }
  0x47   :  { %2411 = vmatprep.subr.bf16.mxu0 %v2671_v11  ;;  %2646 = vmatprep.subr.bf16.mxu1 %v2671_v11 }
  0x4a   :  { %2412 = vmatpush3.bf16.msra.mxu0 %v2671_v11  ;;  %2654 = vmatpush3.bf16.msra.mxu1 %v2671_v11 }
  0x4b   :  { %2413 = vmatprep.subr.bf16.mxu0 %v2672_v12  ;;  %2647 = vmatprep.subr.bf16.mxu1 %v2672_v12 }
  0x4e   :  { %2414 = vmatpush3.bf16.msra.mxu0 %v2672_v12  ;;  %2655 = vmatpush3.bf16.msra.mxu1 %v2672_v12 }
  0x4f   :  { %2415 = vmatprep.subr.bf16.mxu0 %v2673_v13  ;;  %2648 = vmatprep.subr.bf16.mxu1 %v2673_v13 }
  0x52   :  { %2416 = vmatpush3.bf16.msra.mxu0 %v2673_v13  ;;  %2656 = vmatpush3.bf16.msra.mxu1 %v2673_v13 }
  0x53   :  { %2449 = vmatprep.subr.bf16.mxu1 %v2674_v22 }
  0x55   :  { %2418 = vmatmul.mubr.bf16.vlgmr.msra.gmra.mxu0 %v107_v23  ;;  %2434 = vmatmul.mubr.bf16.vlgmr.msra.gmra.mxu1 %v115_v25 }
  0x56   :  { %2421 = vmatprep.mubr.bf16.mxu0 %v108_v24  ;;  %2437 = vmatprep.mubr.bf16.mxu1 %v116_v27 }
  0x57   :  { %2450 = vmatpush3.bf16.msra.mxu1 %v2674_v22 }
  0x58   :  { %2451 = vmatprep.subr.bf16.mxu1 %v2675_v26 }
  0x5b   :  { %2452 = vmatpush3.bf16.msra.mxu1 %v2675_v26 }
  0x5c   :  { %2453 = vmatprep.subr.bf16.mxu1 %v2676_v36 }
  0x5d   :  { %2422 = vmatmul.mubr.bf16.gmra.mxu0 %v109_v37  ;;  %2438 = vmatmul.mubr.bf16.gmra.mxu1 %v117_v39 }
  0x5e   :  { %2425 = vmatprep.mubr.bf16.mxu0 %v110_v38  ;;  %2441 = vmatprep.mubr.bf16.mxu1 %v118_v41 }
  0x5f   :  { %2454 = vmatpush3.bf16.msra.mxu1 %v2676_v36 }
  0x60   :  { %2455 = vmatprep.subr.bf16.mxu1 %v2677_v40 }
  0x63   :  { %2456 = vmatpush3.bf16.msra.mxu1 %v2677_v40 }
  0x64   :  { %2457 = vmatprep.subr.bf16.mxu1 %v2678_v50 }
  0x65   :  { %2426 = vmatmul.mubr.bf16.gmra.mxu0 %v111_v51  ;;  %2442 = vmatmul.mubr.bf16.gmra.mxu1 %v119_v53 }
  0x66   :  { %2429 = vmatprep.mubr.bf16.mxu0 %v112_v52  ;;  %2445 = vmatprep.mubr.bf16.mxu1 %v120_v54 }
  0x67   :  { %2458 = vmatpush3.bf16.msra.mxu1 %v2678_v50 }
  0x68   :  { %2459 = vmatprep.subr.bf16.mxu1 %v2679_v55 }
  0x6b   :  { %2460 = vmatpush3.bf16.msra.mxu1 %v2679_v55 }
  0x6c   :  { %2461 = vmatprep.subr.bf16.mxu1 %v2680_v62 }
  0x6d   :  { %2430 = vmatmul.mubr.bf16.gmra.mxu0 %v113_v60  ;;  %2446 = vmatmul.mubr.bf16.gmra.mxu1 %v121_v61 }
  0x6f   :  { %2462 = vmatpush3.bf16.msra.mxu1 %v2680_v62 }
  0x70   :  { %2463 = vmatprep.subr.bf16.mxu1 %v2681_v63 }
  0x73   :  { %2464 = vmatpush3.bf16.msra.mxu1 %v2681_v63 }
 0x115   :  { %v2419_v0 = vpop.f32.mrf.mxu0  ;;  %v2878_v1 = vpop.f32.mrf.mxu1 }
 0x116   :  { %v234_v12 = vadd.f32 %v2419_v0, %v2880_v5  ;;  %v298_v58 = vadd.f32 %v2878_v1, %v2880_v5 }
 0x117   :  { %v225_v2 = vpop.f32.mrf.mxu0  ;;  %v289_v3 = vpop.f32.mrf.mxu1 }
 0x118   :  { %v226_v9 = vadd.f32 %v2880_v5, %v225_v2  ;;  %v290_v44 = vadd.f32 %v2880_v5, %v289_v3 }
 0x119   :  { %v2420_v4 = vpop.f32.mrf.mxu0  ;;  %v2436_v6 = vpop.f32.mrf.mxu1 }
 0x11a   :  { %v237_v7 = vadd.f32 %v2420_v4, %v2880_v5  ;;  %v301_v59 = vadd.f32 %v2436_v6, %v2880_v5 }
 0x11b   :  { %v228_v8 = vpop.f32.mrf.mxu0  ;;  %v292_v11 = vpop.f32.mrf.mxu1 }
 0x11c   :  { %v229_v10 = vadd.f32 %v2880_v5, %v228_v8  ;;  %v353_v16 = vpack.c.bf16 %v237_v7, %v234_v12  ;;  %v293_v45 = vadd.f32 %v2880_v5, %v292_v11  ;;  %v361_v62 = vpack.c.bf16 %v301_v59, %v298_v58 }
 0x11d   :  { %v2423_v13 = vpop.f32.mrf.mxu0  ;;  %v2439_v15 = vpop.f32.mrf.mxu1 }
 0x11e   :  { %v352_v14 = vpack.c.bf16 %v229_v10, %v226_v9  ;;  %v250_v25 = vadd.f32 %v2423_v13, %v2880_v5  ;;  %v360_v53 = vpack.c.bf16 %v293_v45, %v290_v44  ;;  %v314_v3 = vadd.f32 %v2439_v15, %v2880_v5 }
 0x11f   :  { %v241_v17 = vpop.f32.mrf.mxu0  ;;  %v305_v18 = vpop.f32.mrf.mxu1 }
 0x120   :  { %2465 = vmatprep.mubr.bf16.mxu1 %v352_v14  ;;  %v242_v23 = vadd.f32 %v2880_v5, %v241_v17  ;;  %v306_v56 = vadd.f32 %v2880_v5, %v305_v18 }
 0x121   :  { %v2424_v19 = vpop.f32.mrf.mxu0  ;;  %2466 = vmatmul.mubr.bf16.vlgmr.msra.gmra.mxu1 %v353_v16  ;;  %v2440_v22 = vpop.f32.mrf.mxu1 }
 0x122   :  { %v253_v20 = vadd.f32 %v2424_v19, %v2880_v5  ;;  %v317_v4 = vadd.f32 %v2440_v22, %v2880_v5 }
 0x123   :  { %v244_v21 = vpop.f32.mrf.mxu0  ;;  %v308_v30 = vpop.f32.mrf.mxu1 }
 0x124   :  { %v245_v24 = vadd.f32 %v2880_v5, %v244_v21  ;;  %v355_v28 = vpack.c.bf16 %v253_v20, %v250_v25  ;;  %v309_v57 = vadd.f32 %v2880_v5, %v308_v30  ;;  %v363_v9 = vpack.c.bf16 %v317_v4, %v314_v3  ;;  %v2915_v21 = vld [vmem:[#allocation8 + $0x1] ss:$0 sm:$0xff] }
 0x125   :  { %v2427_v26 = vpop.f32.mrf.mxu0  ;;  %v2443_v34 = vpop.f32.mrf.mxu1 }
 0x126   :  { %v354_v27 = vpack.c.bf16 %v245_v24, %v242_v23  ;;  %v266_v37 = vadd.f32 %v2427_v26, %v2880_v5  ;;  %v362_v61 = vpack.c.bf16 %v309_v57, %v306_v56  ;;  %v330_v11 = vadd.f32 %v2443_v34, %v2880_v5 }
 0x127   :  { %v257_v29 = vpop.f32.mrf.mxu0  ;;  %v321_v42 = vpop.f32.mrf.mxu1 }
 0x128   :  { %2469 = vmatprep.mubr.bf16.mxu1 %v354_v27  ;;  %v258_v35 = vadd.f32 %v2880_v5, %v257_v29  ;;  %v322_v0 = vadd.f32 %v2880_v5, %v321_v42 }
 0x129   :  { %v2428_v31 = vpop.f32.mrf.mxu0  ;;  %2470 = vmatmul.mubr.bf16.gmra.mxu1 %v355_v28  ;;  %v2444_v48 = vpop.f32.mrf.mxu1 }
 0x12a   :  { %v269_v32 = vadd.f32 %v2428_v31, %v2880_v5  ;;  %v333_v12 = vadd.f32 %v2444_v48, %v2880_v5 }
 0x12b   :  { %v260_v33 = vpop.f32.mrf.mxu0  ;;  %v324_v55 = vpop.f32.mrf.mxu1 }
 0x12c   :  { %v261_v36 = vadd.f32 %v2880_v5, %v260_v33  ;;  %v357_v40 = vpack.c.bf16 %v269_v32, %v266_v37  ;;  %v325_v2 = vadd.f32 %v2880_v5, %v324_v55  ;;  %v365_v14 = vpack.c.bf16 %v333_v12, %v330_v11 }
 0x12d   :  { %v2431_v38 = vpop.f32.mrf.mxu0  ;;  %v2447_v60 = vpop.f32.mrf.mxu1 }
 0x12e   :  { %v356_v39 = vpack.c.bf16 %v261_v36, %v258_v35  ;;  %v282_v51 = vadd.f32 %v2431_v38, %v2880_v5  ;;  %v364_v8 = vpack.c.bf16 %v325_v2, %v322_v0  ;;  %v346_v15 = vadd.f32 %v2447_v60, %v2880_v5 }
 0x12f   :  { %v273_v41 = vpop.f32.mrf.mxu0  ;;  %v337_v63 = vpop.f32.mrf.mxu1 }
 0x130   :  { %2473 = vmatprep.mubr.bf16.mxu1 %v356_v39  ;;  %v274_v49 = vadd.f32 %v2880_v5, %v273_v41  ;;  %v338_v6 = vadd.f32 %v2880_v5, %v337_v63 }
 0x131   :  { %v2432_v43 = vpop.f32.mrf.mxu0  ;;  %2474 = vmatmul.mubr.bf16.gmra.mxu1 %v357_v40  ;;  %v2448_v7 = vpop.f32.mrf.mxu1 }
 0x132   :  { %v285_v46 = vadd.f32 %v2432_v43, %v2880_v5  ;;  %v349_v16 = vadd.f32 %v2448_v7, %v2880_v5 }
 0x133   :  { %v276_v47 = vpop.f32.mrf.mxu0  ;;  %v340_v1 = vpop.f32.mrf.mxu1 }
 0x134   :  { %v277_v50 = vadd.f32 %v2880_v5, %v276_v47  ;;  %v359_v54 = vpack.c.bf16 %v285_v46, %v282_v51  ;;  %v341_v10 = vadd.f32 %v2880_v5, %v340_v1  ;;  %v367_v17 = vpack.c.bf16 %v349_v16, %v346_v15 }
 0x136   :  { %v358_v52 = vpack.c.bf16 %v277_v50, %v274_v49  ;;  %v366_v13 = vpack.c.bf16 %v341_v10, %v338_v6 }
 0x138   :  { %2477 = vmatprep.mubr.bf16.mxu1 %v358_v52 }
 0x139   :  { %2478 = vmatmul.mubr.bf16.gmra.mxu1 %v359_v54 }
 0x13a   :  { %2481 = vmatprep.mubr.bf16.mxu1 %v360_v53 }
 0x141   :  { %2482 = vmatmul.mubr.bf16.gmra.mxu1 %v361_v62 }
 0x142   :  { %2485 = vmatprep.mubr.bf16.mxu1 %v362_v61 }
 0x149   :  { %2486 = vmatmul.mubr.bf16.gmra.mxu1 %v363_v9 }
 0x14a   :  { %2489 = vmatprep.mubr.bf16.mxu1 %v364_v8 }
 0x151   :  { %2490 = vmatmul.mubr.bf16.gmra.mxu1 %v365_v14 }
 0x152   :  { %2493 = vmatprep.mubr.bf16.mxu1 %v366_v13 }
 0x159   :  { %2494 = vmatmul.mubr.bf16.gmra.mxu1 %v367_v17 }
 0x1e1   :  { %v2467_v18 = vpop.f32.mrf.mxu1 }
 0x1e2   :  { %v2924_v26 = vadd.f32 %v2467_v18, %v2915_v21 }
 0x1e3   :  { %v471_v19 = vpop.f32.mrf.mxu1 }
 0x1e4   :  { %v2918_v23 = vadd.f32 %v2915_v21, %v471_v19 }
 0x1e5   :  { %v2468_v20 = vpop.f32.mrf.mxu1 }
 0x1e6   :  { %v2929_v28 = vadd.f32 %v2468_v20, %v2915_v21 }
 0x1e7   :  { %v474_v22 = vpop.f32.mrf.mxu1 }
 0x1e8   :  { %v2921_v24 = vadd.f32 %v2915_v21, %v474_v22 }
 0x1e9   :  { %v2471_v25 = vpop.f32.mrf.mxu1 }
 0x1ea   :  { %v598_v5 = vadd.f32 %v2921_v24, %v2918_v23  ;;  %v2941_v37 = vadd.f32 %v2471_v25, %v2915_v21 }
 0x1eb   :  { %v487_v27 = vpop.f32.mrf.mxu1 }
 0x1ec   :  { %v599_v29 = vadd.f32 %v598_v5, %v2924_v26  ;;  %v2933_v31 = vadd.f32 %v2915_v21, %v487_v27 }
 0x1ed   :  { %v2472_v30 = vpop.f32.mrf.mxu1 }
 0x1ee   :  { %v600_v32 = vadd.f32 %v599_v29, %v2929_v28  ;;  %v2945_v40 = vadd.f32 %v2472_v30, %v2915_v21 }
 0x1ef   :  { %v490_v33 = vpop.f32.mrf.mxu1 }
 0x1f0   :  { %v601_v34 = vadd.f32 %v600_v32, %v2933_v31  ;;  %v2938_v35 = vadd.f32 %v2915_v21, %v490_v33 }
 0x1f1   :  { %v2475_v36 = vpop.f32.mrf.mxu1 }
 0x1f2   :  { %v602_v38 = vadd.f32 %v601_v34, %v2938_v35  ;;  %v2957_v49 = vadd.f32 %v2475_v36, %v2915_v21 }
 0x1f3   :  { %v503_v39 = vpop.f32.mrf.mxu1 }
 0x1f4   :  { %v603_v41 = vadd.f32 %v602_v38, %v2941_v37  ;;  %v2949_v43 = vadd.f32 %v2915_v21, %v503_v39 }
 0x1f5   :  { %v2476_v42 = vpop.f32.mrf.mxu1 }
 0x1f6   :  { %v604_v44 = vadd.f32 %v603_v41, %v2945_v40  ;;  %v2961_v52 = vadd.f32 %v2476_v42, %v2915_v21  ;;  %v2682_v41 = vld [vmem:[#allocation7 + $0x78] sm:$0xff]  }
 0x1f7   :  { %v506_v45 = vpop.f32.mrf.mxu1  ;;  %2497 = vmatprep.subr.bf16.mxu0 %v2682_v41 }
 0x1f8   :  { %v605_v46 = vadd.f32 %v604_v44, %v2949_v43  ;;  %v2954_v47 = vadd.f32 %v2915_v21, %v506_v45  ;;  %2498 = vmatpush3.bf16.msra.mxu0 %v2682_v41 }
 0x1f9   :  { %v2479_v48 = vpop.f32.mrf.mxu1 }
 0x1fa   :  { %v606_v50 = vadd.f32 %v605_v46, %v2954_v47  ;;  %v2973_v61 = vadd.f32 %v2479_v48, %v2915_v21 }
 0x1fb   :  { %v519_v51 = vpop.f32.mrf.mxu1 }
 0x1fc   :  { %v607_v53 = vadd.f32 %v606_v50, %v2957_v49  ;;  %v2965_v55 = vadd.f32 %v2915_v21, %v519_v51  ;;  %v2683_v51 = vld [vmem:[#allocation7 + $0x70] sm:$0xff]  }
 0x1fd   :  { %v2480_v54 = vpop.f32.mrf.mxu1  ;;  %2499 = vmatprep.subr.bf16.mxu0 %v2683_v51 }
 0x1fe   :  { %v608_v56 = vadd.f32 %v607_v53, %v2961_v52  ;;  %v2977_v0 = vadd.f32 %v2480_v54, %v2915_v21  ;;  %2500 = vmatpush3.bf16.msra.mxu0 %v2683_v51 }
 0x1ff   :  { %v522_v57 = vpop.f32.mrf.mxu1 }
 0x200   :  { %v609_v58 = vadd.f32 %v608_v56, %v2965_v55  ;;  %v2970_v59 = vadd.f32 %v2915_v21, %v522_v57 }
 0x201   :  { %v2483_v60 = vpop.f32.mrf.mxu1 }
 0x202   :  { %v610_v62 = vadd.f32 %v609_v58, %v2970_v59  ;;  %v2989_v10 = vadd.f32 %v2483_v60, %v2915_v21 }
 0x203   :  { %v535_v63 = vpop.f32.mrf.mxu1 }
 0x204   :  { %v611_v2 = vadd.f32 %v610_v62, %v2973_v61  ;;  %v2981_v4 = vadd.f32 %v2915_v21, %v535_v63  ;;  %v2684_v62 = vld [vmem:[#allocation7 + $0x68] sm:$0xff]  }
 0x205   :  { %v2484_v3 = vpop.f32.mrf.mxu1  ;;  %2501 = vmatprep.subr.bf16.mxu0 %v2684_v62 }
 0x206   :  { %v612_v7 = vadd.f32 %v611_v2, %v2977_v0  ;;  %v2993_v13 = vadd.f32 %v2484_v3, %v2915_v21  ;;  %2502 = vmatpush3.bf16.msra.mxu0 %v2684_v62 }
 0x207   :  { %v538_v8 = vpop.f32.mrf.mxu1 }
 0x208   :  { %v613_v9 = vadd.f32 %v612_v7, %v2981_v4  ;;  %v2986_v1 = vadd.f32 %v2915_v21, %v538_v8  ;;  %v2685_v8 = vld [vmem:[#allocation7 + $0x60] sm:$0xff]  }
 0x209   :  { %v2487_v6 = vpop.f32.mrf.mxu1  ;;  %2503 = vmatprep.subr.bf16.mxu0 %v2685_v8 }
 0x20a   :  { %v614_v11 = vadd.f32 %v613_v9, %v2986_v1  ;;  %v3005_v25 = vadd.f32 %v2487_v6, %v2915_v21  ;;  %2504 = vmatpush3.bf16.msra.mxu0 %v2685_v8 }
 0x20b   :  { %v551_v12 = vpop.f32.mrf.mxu1 }
 0x20c   :  { %v615_v14 = vadd.f32 %v614_v11, %v2989_v10  ;;  %v2997_v16 = vadd.f32 %v2915_v21, %v551_v12  ;;  %v2686_v11 = vld [vmem:[#allocation7 + $0x58] sm:$0xff]  }
 0x20d   :  { %v2488_v15 = vpop.f32.mrf.mxu1  ;;  %2505 = vmatprep.subr.bf16.mxu0 %v2686_v11 }
 0x20e   :  { %v616_v17 = vadd.f32 %v615_v14, %v2993_v13  ;;  %v3009_v29 = vadd.f32 %v2488_v15, %v2915_v21  ;;  %2506 = vmatpush3.bf16.msra.mxu0 %v2686_v11  ;;  %v2687_v15 = vld [vmem:[#allocation7 + $0x50] sm:$0xff]  }
 0x20f   :  { %v554_v18 = vpop.f32.mrf.mxu1  ;;  %2507 = vmatprep.subr.bf16.mxu0 %v2687_v15 }
 0x210   :  { %v617_v19 = vadd.f32 %v616_v17, %v2997_v16  ;;  %v3002_v20 = vadd.f32 %v2915_v21, %v554_v18  ;;  %v2688_v18 = vld [vmem:[#allocation7 + $0x48] sm:$0xff]  }
 0x211   :  { %v2491_v22 = vpop.f32.mrf.mxu1 }
 0x212   :  { %v618_v5 = vadd.f32 %v617_v19, %v3002_v20  ;;  %v3021_v44 = vadd.f32 %v2491_v22, %v2915_v21  ;;  %2508 = vmatpush3.bf16.msra.mxu0 %v2687_v15  ;;  %v2689_v19 = vld [vmem:[#allocation7 + $0x40] sm:$0xff]  }
 0x213   :  { %v567_v27 = vpop.f32.mrf.mxu1  ;;  %2509 = vmatprep.subr.bf16.mxu0 %v2688_v18 }
 0x214   :  { %v619_v30 = vadd.f32 %v618_v5, %v3005_v25  ;;  %v3013_v33 = vadd.f32 %v2915_v21, %v567_v27 }
 0x215   :  { %v2492_v32 = vpop.f32.mrf.mxu1 }
 0x216   :  { %v620_v34 = vadd.f32 %v619_v30, %v3009_v29  ;;  %v3025_v48 = vadd.f32 %v2492_v32, %v2915_v21  ;;  %2510 = vmatpush3.bf16.msra.mxu0 %v2688_v18 }
 0x217   :  { %v570_v36 = vpop.f32.mrf.mxu1  ;;  %2511 = vmatprep.subr.bf16.mxu0 %v2689_v19 }
 0x218   :  { %v621_v38 = vadd.f32 %v620_v34, %v3013_v33  ;;  %v3018_v39 = vadd.f32 %v2915_v21, %v570_v36 }
 0x219   :  { %v2495_v42 = vpop.f32.mrf.mxu1 }
 0x21a   :  { %v622_v45 = vadd.f32 %v621_v38, %v3018_v39  ;;  %v3037_v63 = vadd.f32 %v2495_v42, %v2915_v21  ;;  %2512 = vmatpush3.bf16.msra.mxu0 %v2689_v19 }
 0x21b   :  { %v583_v46 = vpop.f32.mrf.mxu1 }
 0x21c   :  { %v623_v50 = vadd.f32 %v622_v45, %v3021_v44  ;;  %v3029_v54 = vadd.f32 %v2915_v21, %v583_v46 }
 0x21d   :  { %v2496_v53 = vpop.f32.mrf.mxu1 }
 0x21e   :  { %v624_v56 = vadd.f32 %v623_v50, %v3025_v48  ;;  %v3041_v3 = vadd.f32 %v2496_v53, %v2915_v21 }
 0x21f   :  { %v586_v57 = vpop.f32.mrf.mxu1 }
 0x220   :  { %v625_v58 = vadd.f32 %v624_v56, %v3029_v54  ;;  %v3034_v60 = vadd.f32 %v2915_v21, %v586_v57 }
 0x222   :  { %v626_v2 = vadd.f32 %v625_v58, %v3034_v60 }
 0x224   :  { %v627_v7 = vadd.f32 %v626_v2, %v3037_v63 }
 0x226   :  { %v628_v9 = vadd.f32 %v627_v7, %v3041_v3 }
 0x228   :  { %v629_v6 = vrot.slane %v628_v9, 4 }
 0x22a   :  { %v630_v12 = vadd.f32 %v629_v6, %v628_v9 }
 0x22c   :  { %v631_v14 = vrot.slane %v630_v12, 2 }
 0x22e   :  { %v632_v17 = vadd.f32 %v631_v14, %v630_v12 }
 0x230   :  { %v633_v21 = vrot.slane %v632_v17, 1 }
 0x232   :  { %v634_v22 = vadd.f32 %v633_v21, %v632_v17 }
 0x234   :  { %v3045_v5 = vmul.f32 0.00390625, %v634_v22 }
 0x236   :  { %v3049_v27 = vsub.f32 %v2918_v23, %v3045_v5  ;;  %v3053_v30 = vsub.f32 %v2921_v24, %v3045_v5  ;;  %v3057_v32 = vsub.f32 %v2924_v26, %v3045_v5  ;;  %v3065_v38 = vsub.f32 %v2929_v28, %v3045_v5 }
 0x237   :  { %v3069_v23 = vsub.f32 %v2933_v31, %v3045_v5  ;;  %v3075_v26 = vsub.f32 %v2938_v35, %v3045_v5  ;;  %v3081_v28 = vsub.f32 %v2941_v37, %v3045_v5  ;;  %v3087_v50 = vsub.f32 %v2945_v40, %v3045_v5 }
 0x238   :  { %v668_v34 = vmul.f32 %v3049_v27, %v3049_v27  ;;  %v669_v36 = vmul.f32 %v3053_v30, %v3053_v30  ;;  %v670_v24 = vmul.f32 %v3057_v32, %v3057_v32  ;;  %v671_v42 = vmul.f32 %v3065_v38, %v3065_v38 }
 0x239   :  { %v672_v31 = vmul.f32 %v3069_v23, %v3069_v23  ;;  %v673_v35 = vmul.f32 %v3075_v26, %v3075_v26  ;;  %v3093_v53 = vsub.f32 %v2949_v43, %v3045_v5  ;;  %v674_v37 = vmul.f32 %v3081_v28, %v3081_v28 }
 0x23a   :  { %v700_v41 = vadd.f32 %v669_v36, %v668_v34  ;;  %v3099_v57 = vsub.f32 %v2954_v47, %v3045_v5  ;;  %v675_v40 = vmul.f32 %v3087_v50, %v3087_v50  ;;  %v3105_v62 = vsub.f32 %v2957_v49, %v3045_v5 }
 0x23b   :  { %v676_v43 = vmul.f32 %v3093_v53, %v3093_v53  ;;  %v3111_v7 = vsub.f32 %v2961_v52, %v3045_v5  ;;  %v3117_v9 = vsub.f32 %v2965_v55, %v3045_v5  ;;  %v3123_v11 = vsub.f32 %v2970_v59, %v3045_v5 }
 0x23c   :  { %v701_v45 = vadd.f32 %v700_v41, %v670_v24  ;;  %v677_v47 = vmul.f32 %v3099_v57, %v3099_v57  ;;  %v678_v49 = vmul.f32 %v3105_v62, %v3105_v62  ;;  %v3129_v14 = vsub.f32 %v2973_v61, %v3045_v5 }
 0x23d   :  { %v679_v52 = vmul.f32 %v3111_v7, %v3111_v7  ;;  %v680_v55 = vmul.f32 %v3117_v9, %v3117_v9  ;;  %v3135_v17 = vsub.f32 %v2977_v0, %v3045_v5  ;;  %v681_v59 = vmul.f32 %v3123_v11, %v3123_v11 }
 0x23e   :  { %v702_v46 = vadd.f32 %v701_v45, %v671_v42  ;;  %v3141_v21 = vsub.f32 %v2981_v4, %v3045_v5  ;;  %v682_v61 = vmul.f32 %v3129_v14, %v3129_v14  ;;  %v3147_v22 = vsub.f32 %v2986_v1, %v3045_v5 }
 0x23f   :  { %v683_v0 = vmul.f32 %v3135_v17, %v3135_v17  ;;  %v3153_v36 = vsub.f32 %v2989_v10, %v3045_v5  ;;  %v3159_v41 = vsub.f32 %v2993_v13, %v3045_v5  ;;  %v3165_v45 = vsub.f32 %v2997_v16, %v3045_v5 }
 0x240   :  { %v703_v51 = vadd.f32 %v702_v46, %v672_v31  ;;  %v684_v4 = vmul.f32 %v3141_v21, %v3141_v21  ;;  %v685_v1 = vmul.f32 %v3147_v22, %v3147_v22  ;;  %v3171_v46 = vsub.f32 %v3002_v20, %v3045_v5 }
 0x241   :  { %v686_v10 = vmul.f32 %v3153_v36, %v3153_v36  ;;  %v687_v13 = vmul.f32 %v3159_v41, %v3159_v41  ;;  %v688_v16 = vmul.f32 %v3165_v45, %v3165_v45 }
 0x242   :  { %v704_v56 = vadd.f32 %v703_v51, %v673_v35  ;;  %v3177_v51 = vsub.f32 %v3005_v25, %v3045_v5  ;;  %v689_v20 = vmul.f32 %v3171_v46, %v3171_v46 }
 0x244   :  { %v705_v58 = vadd.f32 %v704_v56, %v674_v37  ;;  %v3183_v56 = vsub.f32 %v3009_v29, %v3045_v5  ;;  %v690_v25 = vmul.f32 %v3177_v51, %v3177_v51 }
 0x246   :  { %v706_v2 = vadd.f32 %v705_v58, %v675_v40  ;;  %v3189_v58 = vsub.f32 %v3013_v33, %v3045_v5  ;;  %v691_v29 = vmul.f32 %v3183_v56, %v3183_v56 }
 0x248   :  { %v707_v8 = vadd.f32 %v706_v2, %v676_v43  ;;  %v3195_v2 = vsub.f32 %v3018_v39, %v3045_v5  ;;  %v692_v33 = vmul.f32 %v3189_v58, %v3189_v58 }
 0x24a   :  { %v708_v6 = vadd.f32 %v707_v8, %v677_v47  ;;  %v3201_v8 = vsub.f32 %v3021_v44, %v3045_v5  ;;  %v693_v39 = vmul.f32 %v3195_v2, %v3195_v2 }
 0x24c   :  { %v709_v12 = vadd.f32 %v708_v6, %v678_v49  ;;  %v3207_v6 = vsub.f32 %v3025_v48, %v3045_v5  ;;  %v694_v44 = vmul.f32 %v3201_v8, %v3201_v8 }
 0x24e   :  { %v710_v15 = vadd.f32 %v709_v12, %v679_v52  ;;  %v3213_v12 = vsub.f32 %v3029_v54, %v3045_v5  ;;  %v695_v48 = vmul.f32 %v3207_v6, %v3207_v6 }
 0x250   :  { %v711_v18 = vadd.f32 %v710_v15, %v680_v55  ;;  %v3219_v15 = vsub.f32 %v3034_v60, %v3045_v5  ;;  %v696_v54 = vmul.f32 %v3213_v12, %v3213_v12 }
 0x252   :  { %v712_v19 = vadd.f32 %v711_v18, %v681_v59  ;;  %v3225_v18 = vsub.f32 %v3037_v63, %v3045_v5  ;;  %v697_v60 = vmul.f32 %v3219_v15, %v3219_v15 }
 0x254   :  { %v713_v34 = vadd.f32 %v712_v19, %v682_v61  ;;  %v3231_v19 = vsub.f32 %v3041_v3, %v3045_v5 }
 0x256   :  { %v714_v24 = vadd.f32 %v713_v34, %v683_v0  ;;  %v698_v34 = vmul.f32 %v3225_v18, %v3225_v18  ;;  %v699_v63 = vmul.f32 %v3231_v19, %v3231_v19 }
 0x258   :  { %v715_v42 = vadd.f32 %v714_v24, %v684_v4 }
 0x25a   :  { %v716_v31 = vadd.f32 %v715_v42, %v685_v1 }
 0x25c   :  { %v717_v35 = vadd.f32 %v716_v31, %v686_v10 }
 0x25e   :  { %v718_v37 = vadd.f32 %v717_v35, %v687_v13 }
 0x260   :  { %v719_v40 = vadd.f32 %v718_v37, %v688_v16 }
 0x262   :  { %v720_v43 = vadd.f32 %v719_v40, %v689_v20 }
 0x264   :  { %v721_v47 = vadd.f32 %v720_v43, %v690_v25 }
 0x266   :  { %v722_v49 = vadd.f32 %v721_v47, %v691_v29  ;;  %v3249_v29 = vld [vmem:[#allocation8 + $0x2] ss:$0 sm:$0xff] }
 0x268   :  { %v723_v52 = vadd.f32 %v722_v49, %v692_v33 }
 0x26a   :  { %v724_v55 = vadd.f32 %v723_v52, %v693_v39  ;;  %v3263_v52 = vld [vmem:[#allocation8 + $0x3] ss:$0 sm:$0xff] }
 0x26c   :  { %v725_v59 = vadd.f32 %v724_v55, %v694_v44 }
 0x26e   :  { %v726_v61 = vadd.f32 %v725_v59, %v695_v48 }
 0x270   :  { %v727_v0 = vadd.f32 %v726_v61, %v696_v54 }
 0x272   :  { %v728_v4 = vadd.f32 %v727_v0, %v697_v60 }
 0x274   :  { %v729_v24 = vadd.f32 %v728_v4, %v698_v34 }
 0x276   :  { %v730_v1 = vadd.f32 %v729_v24, %v699_v63 }
 0x278   :  { %v731_v42 = vrot.slane %v730_v1, 4 }
 0x27a   :  { %v732_v10 = vadd.f32 %v731_v42, %v730_v1 }
 0x27c   :  { %v733_v31 = vrot.slane %v732_v10, 2 }
 0x27e   :  { %v734_v13 = vadd.f32 %v733_v31, %v732_v10 }
 0x280   :  { %v735_v35 = vrot.slane %v734_v13, 1 }
 0x282   :  { %v736_v3 = vadd.f32 %v735_v35, %v734_v13 }
 0x284   :  { %v737_v5 = vmul.f32 0.00390625, %v736_v3 }
 0x286   :  { %v740_v16 = vadd.f32 1e-05, %v737_v5 }
 0x288   :  { %2706 = vrsqrt.f32 %v740_v16 }
 0x295   :  { %v3239_v37 = vpop.eup %2706 }
 0x296   :  { %v742_v20 = vmul.f32 %v3239_v37, %v3049_v27  ;;  %v743_v40 = vmul.f32 %v3239_v37, %v3053_v30  ;;  %v744_v25 = vmul.f32 %v3239_v37, %v3057_v32  ;;  %v745_v43 = vmul.f32 %v3239_v37, %v3065_v38 }
 0x297   :  { %v746_v47 = vmul.f32 %v3239_v37, %v3069_v23  ;;  %v747_v33 = vmul.f32 %v3239_v37, %v3075_v26  ;;  %v748_v27 = vmul.f32 %v3239_v37, %v3081_v28  ;;  %v749_v30 = vmul.f32 %v3239_v37, %v3087_v50 }
 0x298   :  { %v778_v49 = vmul.f32 %v3249_v29, %v742_v20  ;;  %v779_v32 = vmul.f32 %v3249_v29, %v743_v40  ;;  %v780_v38 = vmul.f32 %v3249_v29, %v744_v25  ;;  %v781_v39 = vmul.f32 %v3249_v29, %v745_v43 }
 0x299   :  { %v750_v23 = vmul.f32 %v3239_v37, %v3093_v53  ;;  %v751_v26 = vmul.f32 %v3239_v37, %v3099_v57  ;;  %v782_v28 = vmul.f32 %v3249_v29, %v746_v47  ;;  %v783_v50 = vmul.f32 %v3249_v29, %v747_v33 }
 0x29a   :  { %v784_v44 = vmul.f32 %v3249_v29, %v748_v27  ;;  %v785_v55 = vmul.f32 %v3249_v29, %v749_v30  ;;  %v816_v48 = vadd.f32 %v3263_v52, %v780_v38  ;;  %v817_v59 = vadd.f32 %v3263_v52, %v781_v39 }
 0x29b   :  { %v814_v54 = vadd.f32 %v3263_v52, %v778_v49  ;;  %v815_v61 = vadd.f32 %v3263_v52, %v779_v32  ;;  %v786_v53 = vmul.f32 %v3249_v29, %v750_v23  ;;  %v787_v57 = vmul.f32 %v3249_v29, %v751_v26 }
 0x29c   :  { %v818_v60 = vadd.f32 %v3263_v52, %v782_v28  ;;  %v819_v0 = vadd.f32 %v3263_v52, %v783_v50  ;;  %v848_v34 = vmax.f32 %v816_v48, 0.0  ;;  %v849_v4 = vmax.f32 %v817_v59, 0.0 }
 0x29d   :  { %v846_v63 = vmax.f32 %v814_v54, 0.0  ;;  %v847_v24 = vmax.f32 %v815_v61, 0.0  ;;  %v752_v10 = vmul.f32 %v3239_v37, %v3105_v62  ;;  %v753_v35 = vmul.f32 %v3239_v37, %v3111_v7 }
 0x29e   :  { %v850_v1 = vmax.f32 %v818_v60, 0.0  ;;  %v851_v42 = vmax.f32 %v819_v0, 0.0  ;;  %v879_v31 = vpack.c.bf16 %v849_v4, %v848_v34  ;;  %v754_v3 = vmul.f32 %v3239_v37, %v3117_v9 }
 0x29f   :  { %v878_v13 = vpack.c.bf16 %v847_v24, %v846_v63  ;;  %v820_v5 = vadd.f32 %v3263_v52, %v784_v44  ;;  %v821_v16 = vadd.f32 %v3263_v52, %v785_v55  ;;  %v755_v20 = vmul.f32 %v3239_v37, %v3123_v11 }
 0x2a0   :  { %v880_v40 = vpack.c.bf16 %v851_v42, %v850_v1  ;;  %v822_v25 = vadd.f32 %v3263_v52, %v786_v53  ;;  %v823_v62 = vadd.f32 %v3263_v52, %v787_v57  ;;  %v788_v7 = vmul.f32 %v3249_v29, %v752_v10 }
 0x2a1   :  { %2513 = vmatprep.mubr.bf16.mxu0 %v878_v13  ;;  %v789_v43 = vmul.f32 %v3249_v29, %v753_v35  ;;  %v852_v9 = vmax.f32 %v820_v5, 0.0  ;;  %v853_v47 = vmax.f32 %v821_v16, 0.0  ;;  %v790_v33 = vmul.f32 %v3249_v29, %v754_v3 }
 0x2a2   :  { %2514 = vmatmul.mubr.bf16.vlgmr.msra.gmra.mxu0 %v879_v31  ;;  %v791_v27 = vmul.f32 %v3249_v29, %v755_v20  ;;  %v854_v30 = vmax.f32 %v822_v25, 0.0  ;;  %v855_v11 = vmax.f32 %v823_v62, 0.0  ;;  %v756_v49 = vmul.f32 %v3239_v37, %v3129_v14 }
 0x2a3   :  { %2517 = vmatprep.mubr.bf16.mxu0 %v880_v40  ;;  %v757_v32 = vmul.f32 %v3239_v37, %v3135_v17  ;;  %v758_v38 = vmul.f32 %v3239_v37, %v3141_v21  ;;  %v881_v39 = vpack.c.bf16 %v853_v47, %v852_v9  ;;  %v824_v23 = vadd.f32 %v3263_v52, %v788_v7 }
 0x2a4   :  { %v825_v26 = vadd.f32 %v3263_v52, %v789_v43  ;;  %v759_v28 = vmul.f32 %v3239_v37, %v3147_v22  ;;  %v882_v50 = vpack.c.bf16 %v855_v11, %v854_v30  ;;  %v826_v44 = vadd.f32 %v3263_v52, %v790_v33 }
 0x2a5   :  { %v827_v55 = vadd.f32 %v3263_v52, %v791_v27  ;;  %v792_v14 = vmul.f32 %v3249_v29, %v756_v49  ;;  %v793_v17 = vmul.f32 %v3249_v29, %v757_v32  ;;  %v856_v21 = vmax.f32 %v824_v23, 0.0 }
 0x2a6   :  { %v857_v48 = vmax.f32 %v825_v26, 0.0  ;;  %v794_v59 = vmul.f32 %v3249_v29, %v758_v38  ;;  %v795_v54 = vmul.f32 %v3249_v29, %v759_v28  ;;  %v858_v61 = vmax.f32 %v826_v44, 0.0 }
 0x2a7   :  { %v859_v53 = vmax.f32 %v827_v55, 0.0  ;;  %v760_v22 = vmul.f32 %v3239_v37, %v3153_v36  ;;  %v761_v57 = vmul.f32 %v3239_v37, %v3159_v41  ;;  %v762_v60 = vmul.f32 %v3239_v37, %v3165_v45 }
 0x2a8   :  { %v883_v0 = vpack.c.bf16 %v857_v48, %v856_v21  ;;  %v828_v34 = vadd.f32 %v3263_v52, %v792_v14  ;;  %v829_v4 = vadd.f32 %v3263_v52, %v793_v17  ;;  %v763_v63 = vmul.f32 %v3239_v37, %v3171_v46 }
 0x2a9   :  { %v884_v24 = vpack.c.bf16 %v859_v53, %v858_v61  ;;  %v830_v1 = vadd.f32 %v3263_v52, %v794_v59  ;;  %v831_v42 = vadd.f32 %v3263_v52, %v795_v54  ;;  %v796_v36 = vmul.f32 %v3249_v29, %v760_v22 }
 0x2aa   :  { %2518 = vmatmul.mubr.bf16.gmra.mxu0 %v881_v39  ;;  %v797_v41 = vmul.f32 %v3249_v29, %v761_v57  ;;  %v860_v45 = vmax.f32 %v828_v34, 0.0  ;;  %v861_v10 = vmax.f32 %v829_v4, 0.0  ;;  %v798_v31 = vmul.f32 %v3249_v29, %v762_v60 }
 0x2ab   :  { %2521 = vmatprep.mubr.bf16.mxu0 %v882_v50  ;;  %v799_v13 = vmul.f32 %v3249_v29, %v763_v63  ;;  %v862_v35 = vmax.f32 %v830_v1, 0.0  ;;  %v863_v3 = vmax.f32 %v831_v42, 0.0  ;;  %v764_v46 = vmul.f32 %v3239_v37, %v3177_v51 }
 0x2ac   :  { %v765_v5 = vmul.f32 %v3239_v37, %v3183_v56  ;;  %v766_v16 = vmul.f32 %v3239_v37, %v3189_v58  ;;  %v885_v20 = vpack.c.bf16 %v861_v10, %v860_v45  ;;  %v832_v40 = vadd.f32 %v3263_v52, %v796_v36 }
 0x2ad   :  { %v833_v25 = vadd.f32 %v3263_v52, %v797_v41  ;;  %v767_v62 = vmul.f32 %v3239_v37, %v3195_v2  ;;  %v886_v7 = vpack.c.bf16 %v863_v3, %v862_v35  ;;  %v834_v43 = vadd.f32 %v3263_v52, %v798_v31 }
 0x2ae   :  { %v835_v9 = vadd.f32 %v3263_v52, %v799_v13  ;;  %v800_v51 = vmul.f32 %v3249_v29, %v764_v46  ;;  %v801_v56 = vmul.f32 %v3249_v29, %v765_v5  ;;  %v864_v58 = vmax.f32 %v832_v40, 0.0 }
 0x2af   :  { %v865_v47 = vmax.f32 %v833_v25, 0.0  ;;  %v802_v33 = vmul.f32 %v3249_v29, %v766_v16  ;;  %v803_v27 = vmul.f32 %v3249_v29, %v767_v62  ;;  %v866_v30 = vmax.f32 %v834_v43, 0.0 }
 0x2b0   :  { %v867_v11 = vmax.f32 %v835_v9, 0.0  ;;  %v771_v2 = vmul.f32 %v3239_v37, %v3219_v15  ;;  %v768_v49 = vmul.f32 %v3239_v37, %v3201_v8  ;;  %v769_v32 = vmul.f32 %v3239_v37, %v3207_v6 }
 0x2b1   :  { %v887_v38 = vpack.c.bf16 %v865_v47, %v864_v58  ;;  %v836_v39 = vadd.f32 %v3263_v52, %v800_v51  ;;  %v837_v23 = vadd.f32 %v3263_v52, %v801_v56  ;;  %v770_v26 = vmul.f32 %v3239_v37, %v3213_v12 }
 0x2b2   :  { %2522 = vmatmul.mubr.bf16.gmra.mxu0 %v883_v0  ;;  %v888_v28 = vpack.c.bf16 %v867_v11, %v866_v30  ;;  %v838_v50 = vadd.f32 %v3263_v52, %v802_v33  ;;  %v839_v44 = vadd.f32 %v3263_v52, %v803_v27  ;;  %v804_v8 = vmul.f32 %v3249_v29, %v768_v49 }
 0x2b3   :  { %2525 = vmatprep.mubr.bf16.mxu0 %v884_v24  ;;  %v805_v15 = vmul.f32 %v3249_v29, %v769_v32  ;;  %v868_v6 = vmax.f32 %v836_v39, 0.0  ;;  %v869_v55 = vmax.f32 %v837_v23, 0.0  ;;  %v807_v14 = vmul.f32 %v3249_v29, %v771_v2 }
 0x2b4   :  { %v806_v17 = vmul.f32 %v3249_v29, %v770_v26  ;;  %v870_v21 = vmax.f32 %v838_v50, 0.0  ;;  %v871_v48 = vmax.f32 %v839_v44, 0.0  ;;  %v772_v12 = vmul.f32 %v3239_v37, %v3225_v18 }
 0x2b5   :  { %v773_v59 = vmul.f32 %v3239_v37, %v3231_v19  ;;  %v889_v54 = vpack.c.bf16 %v869_v55, %v868_v6  ;;  %v840_v61 = vadd.f32 %v3263_v52, %v804_v8  ;;  %v841_v53 = vadd.f32 %v3263_v52, %v805_v15 }
 0x2b6   :  { %v890_v22 = vpack.c.bf16 %v871_v48, %v870_v21  ;;  %v842_v57 = vadd.f32 %v3263_v52, %v806_v17  ;;  %v843_v60 = vadd.f32 %v3263_v52, %v807_v14  ;;  %v808_v0 = vmul.f32 %v3249_v29, %v772_v12 }
 0x2b7   :  { %v809_v34 = vmul.f32 %v3249_v29, %v773_v59  ;;  %v872_v18 = vmax.f32 %v840_v61, 0.0  ;;  %v873_v4 = vmax.f32 %v841_v53, 0.0  ;;  %v3373_v29 = vld [vmem:[#allocation8 + $0x4] ss:$0 sm:$0xff] }
 0x2b8   :  { %v874_v63 = vmax.f32 %v842_v57, 0.0  ;;  %v875_v19 = vmax.f32 %v843_v60, 0.0  ;;  %v844_v24 = vadd.f32 %v3263_v52, %v808_v0 }
 0x2b9   :  { %v891_v37 = vpack.c.bf16 %v873_v4, %v872_v18  ;;  %v845_v1 = vadd.f32 %v3263_v52, %v809_v34 }
 0x2ba   :  { %2526 = vmatmul.mubr.bf16.gmra.mxu0 %v885_v20  ;;  %v892_v42 = vpack.c.bf16 %v875_v19, %v874_v63  ;;  %v876_v36 = vmax.f32 %v844_v24, 0.0 }
 0x2bb   :  { %2529 = vmatprep.mubr.bf16.mxu0 %v886_v7  ;;  %v877_v41 = vmax.f32 %v845_v1, 0.0 }
 0x2bd   :  { %v893_v45 = vpack.c.bf16 %v877_v41, %v876_v36 }
 0x2c2   :  { %2530 = vmatmul.mubr.bf16.gmra.mxu0 %v887_v38 }
 0x2c3   :  { %2533 = vmatprep.mubr.bf16.mxu0 %v888_v28 }
 0x2ca   :  { %2534 = vmatmul.mubr.bf16.gmra.mxu0 %v889_v54 }
 0x2cb   :  { %2537 = vmatprep.mubr.bf16.mxu0 %v890_v22 }
 0x2d2   :  { %2538 = vmatmul.mubr.bf16.gmra.mxu0 %v891_v37 }
 0x2d3   :  { %2541 = vmatprep.mubr.bf16.mxu0 %v892_v42 }
 0x2da   :  { %2542 = vmatmul.mubr.bf16.gmra.mxu0 %v893_v45 }
 0x362   :  { %v2515_v10 = vpop.f32.mrf.mxu0 }
 0x363   :  { %v3382_v5 = vadd.f32 %v2515_v10, %v3373_v29 }
 0x364   :  { %v998_v31 = vpop.f32.mrf.mxu0 }
 0x365   :  { %v3376_v3 = vadd.f32 %v3373_v29, %v998_v31 }
 0x366   :  { %v2516_v13 = vpop.f32.mrf.mxu0 }
 0x367   :  { %v3387_v40 = vadd.f32 %v2516_v13, %v3373_v29 }
 0x368   :  { %v1001_v35 = vpop.f32.mrf.mxu0 }
 0x369   :  { %v3379_v46 = vadd.f32 %v3373_v29, %v1001_v35 }
 0x36a   :  { %v2519_v52 = vpop.f32.mrf.mxu0 }
 0x36b   :  { %v1125_v16 = vadd.f32 %v3379_v46, %v3376_v3  ;;  %v3399_v47 = vadd.f32 %v2519_v52, %v3373_v29 }
 0x36c   :  { %v1014_v20 = vpop.f32.mrf.mxu0 }
 0x36d   :  { %v1126_v25 = vadd.f32 %v1125_v16, %v3382_v5  ;;  %v3391_v7 = vadd.f32 %v3373_v29, %v1014_v20 }
 0x36e   :  { %v2520_v62 = vpop.f32.mrf.mxu0 }
 0x36f   :  { %v1127_v43 = vadd.f32 %v1126_v25, %v3387_v40  ;;  %v3403_v30 = vadd.f32 %v2520_v62, %v3373_v29 }
 0x370   :  { %v1017_v9 = vpop.f32.mrf.mxu0 }
 0x371   :  { %v1128_v51 = vadd.f32 %v1127_v43, %v3391_v7  ;;  %v3396_v56 = vadd.f32 %v3373_v29, %v1017_v9 }
 0x372   :  { %v2523_v58 = vpop.f32.mrf.mxu0 }
 0x373   :  { %v1129_v33 = vadd.f32 %v1128_v51, %v3396_v56  ;;  %v3415_v28 = vadd.f32 %v2523_v58, %v3373_v29 }
 0x374   :  { %v1030_v27 = vpop.f32.mrf.mxu0 }
 0x375   :  { %v1130_v11 = vadd.f32 %v1129_v33, %v3399_v47  ;;  %v3407_v49 = vadd.f32 %v3373_v29, %v1030_v27 }
 0x376   :  { %v2524_v2 = vpop.f32.mrf.mxu0 }
 0x377   :  { %v1131_v32 = vadd.f32 %v1130_v11, %v3403_v30  ;;  %v3419_v8 = vadd.f32 %v2524_v2, %v3373_v29  ;;  %v2690_v11 = vld [vmem:[#allocation7 + $0xb8] sm:$0xff]  }
 0x378   :  { %v1033_v38 = vpop.f32.mrf.mxu0  ;;  %2545 = vmatprep.subr.bf16.mxu1 %v2690_v11 }
 0x379   :  { %v1132_v39 = vadd.f32 %v1131_v32, %v3407_v49  ;;  %v3412_v23 = vadd.f32 %v3373_v29, %v1033_v38  ;;  %2546 = vmatpush3.bf16.msra.mxu1 %v2690_v11 }
 0x37a   :  { %v2527_v26 = vpop.f32.mrf.mxu0 }
 0x37b   :  { %v1133_v50 = vadd.f32 %v1132_v39, %v3412_v23  ;;  %v3431_v59 = vadd.f32 %v2527_v26, %v3373_v29 }
 0x37c   :  { %v1046_v44 = vpop.f32.mrf.mxu0 }
 0x37d   :  { %v1134_v15 = vadd.f32 %v1133_v50, %v3415_v28  ;;  %v3423_v55 = vadd.f32 %v3373_v29, %v1046_v44  ;;  %v2691_v44 = vld [vmem:[#allocation7 + $0xb0] sm:$0xff]  }
 0x37e   :  { %v2528_v6 = vpop.f32.mrf.mxu0  ;;  %2547 = vmatprep.subr.bf16.mxu1 %v2691_v44 }
 0x37f   :  { %v1135_v14 = vadd.f32 %v1134_v15, %v3419_v8  ;;  %v3435_v53 = vadd.f32 %v2528_v6, %v3373_v29  ;;  %2548 = vmatpush3.bf16.msra.mxu1 %v2691_v44 }
 0x380   :  { %v1049_v17 = vpop.f32.mrf.mxu0 }
 0x381   :  { %v1136_v21 = vadd.f32 %v1135_v14, %v3423_v55  ;;  %v3428_v48 = vadd.f32 %v3373_v29, %v1049_v17 }
 0x382   :  { %v2531_v12 = vpop.f32.mrf.mxu0 }
 0x383   :  { %v1137_v54 = vadd.f32 %v1136_v21, %v3428_v48  ;;  %v3447_v19 = vadd.f32 %v2531_v12, %v3373_v29 }
 0x384   :  { %v1062_v61 = vpop.f32.mrf.mxu0 }
 0x385   :  { %v1138_v22 = vadd.f32 %v1137_v54, %v3431_v59  ;;  %v3439_v60 = vadd.f32 %v3373_v29, %v1062_v61  ;;  %v2692_v54 = vld [vmem:[#allocation7 + $0xa8] sm:$0xff]  }
 0x386   :  { %v2532_v57 = vpop.f32.mrf.mxu0  ;;  %2549 = vmatprep.subr.bf16.mxu1 %v2692_v54 }
 0x387   :  { %v1139_v0 = vadd.f32 %v1138_v22, %v3435_v53  ;;  %v3451_v1 = vadd.f32 %v2532_v57, %v3373_v29  ;;  %2550 = vmatpush3.bf16.msra.mxu1 %v2692_v54 }
 0x388   :  { %v1065_v34 = vpop.f32.mrf.mxu0 }
 0x389   :  { %v1140_v18 = vadd.f32 %v1139_v0, %v3439_v60  ;;  %v3444_v4 = vadd.f32 %v3373_v29, %v1065_v34  ;;  %v2693_v34 = vld [vmem:[#allocation7 + $0xa0] sm:$0xff]  }
 0x38a   :  { %v2535_v63 = vpop.f32.mrf.mxu0  ;;  %2551 = vmatprep.subr.bf16.mxu1 %v2693_v34 }
 0x38b   :  { %v1141_v37 = vadd.f32 %v1140_v18, %v3444_v4  ;;  %v3463_v52 = vadd.f32 %v2535_v63, %v3373_v29  ;;  %2552 = vmatpush3.bf16.msra.mxu1 %v2693_v34 }
 0x38c   :  { %v1078_v24 = vpop.f32.mrf.mxu0 }
 0x38d   :  { %v1142_v42 = vadd.f32 %v1141_v37, %v3447_v19  ;;  %v3455_v41 = vadd.f32 %v3373_v29, %v1078_v24  ;;  %v2694_v37 = vld [vmem:[#allocation7 + $0x98] sm:$0xff]  }
 0x38e   :  { %v2536_v36 = vpop.f32.mrf.mxu0  ;;  %2553 = vmatprep.subr.bf16.mxu1 %v2694_v37 }
 0x38f   :  { %v1143_v45 = vadd.f32 %v1142_v42, %v3451_v1  ;;  %v3467_v25 = vadd.f32 %v2536_v36, %v3373_v29  ;;  %2554 = vmatpush3.bf16.msra.mxu1 %v2694_v37  ;;  %v2695_v36 = vld [vmem:[#allocation7 + $0x90] sm:$0xff]  }
 0x390   :  { %v1081_v10 = vpop.f32.mrf.mxu0  ;;  %2555 = vmatprep.subr.bf16.mxu1 %v2695_v36 }
 0x391   :  { %v1144_v31 = vadd.f32 %v1143_v45, %v3455_v41  ;;  %v3460_v13 = vadd.f32 %v3373_v29, %v1081_v10  ;;  %v2696_v10 = vld [vmem:[#allocation7 + $0x88] sm:$0xff]  }
 0x392   :  { %v2539_v35 = vpop.f32.mrf.mxu0 }
 0x393   :  { %v1145_v16 = vadd.f32 %v1144_v31, %v3460_v13  ;;  %v3479_v32 = vadd.f32 %v2539_v35, %v3373_v29  ;;  %2556 = vmatpush3.bf16.msra.mxu1 %v2695_v36  ;;  %v2697_v31 = vld [vmem:[#allocation7 + $0x80] sm:$0xff]  }
 0x394   :  { %v1094_v20 = vpop.f32.mrf.mxu0  ;;  %2557 = vmatprep.subr.bf16.mxu1 %v2696_v10 }
 0x395   :  { %v1146_v62 = vadd.f32 %v1145_v16, %v3463_v52  ;;  %v3471_v9 = vadd.f32 %v3373_v29, %v1094_v20 }
 0x396   :  { %v2540_v43 = vpop.f32.mrf.mxu0 }
 0x397   :  { %v1147_v51 = vadd.f32 %v1146_v62, %v3467_v25  ;;  %v3483_v26 = vadd.f32 %v2540_v43, %v3373_v29  ;;  %2558 = vmatpush3.bf16.msra.mxu1 %v2696_v10 }
 0x398   :  { %v1097_v58 = vpop.f32.mrf.mxu0  ;;  %2559 = vmatprep.subr.bf16.mxu1 %v2697_v31 }
 0x399   :  { %v1148_v33 = vadd.f32 %v1147_v51, %v3471_v9  ;;  %v3476_v27 = vadd.f32 %v3373_v29, %v1097_v58 }
 0x39a   :  { %v2543_v2 = vpop.f32.mrf.mxu0 }
 0x39b   :  { %v1149_v38 = vadd.f32 %v1148_v33, %v3476_v27  ;;  %v3495_v61 = vadd.f32 %v2543_v2, %v3373_v29  ;;  %2560 = vmatpush3.bf16.msra.mxu1 %v2697_v31 }
 0x39c   :  { %v1110_v39 = vpop.f32.mrf.mxu0 }
 0x39d   :  { %v1150_v50 = vadd.f32 %v1149_v38, %v3479_v32  ;;  %v3487_v6 = vadd.f32 %v3373_v29, %v1110_v39 }
 0x39e   :  { %v2544_v15 = vpop.f32.mrf.mxu0 }
 0x39f   :  { %v1151_v14 = vadd.f32 %v1150_v50, %v3483_v26  ;;  %v3499_v57 = vadd.f32 %v2544_v15, %v3373_v29 }
 0x3a0   :  { %v1113_v17 = vpop.f32.mrf.mxu0 }
 0x3a1   :  { %v1152_v21 = vadd.f32 %v1151_v14, %v3487_v6  ;;  %v3492_v12 = vadd.f32 %v3373_v29, %v1113_v17 }
 0x3a3   :  { %v1153_v22 = vadd.f32 %v1152_v21, %v3492_v12 }
 0x3a5   :  { %v1154_v0 = vadd.f32 %v1153_v22, %v3495_v61 }
 0x3a7   :  { %v1155_v18 = vadd.f32 %v1154_v0, %v3499_v57 }
 0x3a9   :  { %v1156_v63 = vrot.slane %v1155_v18, 4 }
 0x3ab   :  { %v1157_v24 = vadd.f32 %v1156_v63, %v1155_v18 }
 0x3ad   :  { %v1158_v42 = vrot.slane %v1157_v24, 2 }
 0x3af   :  { %v1159_v45 = vadd.f32 %v1158_v42, %v1157_v24 }
 0x3b1   :  { %v1160_v29 = vrot.slane %v1159_v45, 1 }
 0x3b3   :  { %v1161_v35 = vadd.f32 %v1160_v29, %v1159_v45 }
 0x3b5   :  { %v3503_v16 = vmul.f32 0.00390625, %v1161_v35 }
 0x3b7   :  { %v3507_v20 = vsub.f32 %v3376_v3, %v3503_v16  ;;  %v3511_v62 = vsub.f32 %v3379_v46, %v3503_v16  ;;  %v3515_v43 = vsub.f32 %v3382_v5, %v3503_v16  ;;  %v3523_v33 = vsub.f32 %v3387_v40, %v3503_v16 }
 0x3b8   :  { %v3527_v3 = vsub.f32 %v3391_v7, %v3503_v16  ;;  %v3533_v5 = vsub.f32 %v3396_v56, %v3503_v16  ;;  %v3539_v40 = vsub.f32 %v3399_v47, %v3503_v16  ;;  %v3545_v50 = vsub.f32 %v3403_v30, %v3503_v16 }
 0x3b9   :  { %v1195_v51 = vmul.f32 %v3507_v20, %v3507_v20  ;;  %v1196_v58 = vmul.f32 %v3511_v62, %v3511_v62  ;;  %v1197_v46 = vmul.f32 %v3515_v43, %v3515_v43  ;;  %v1198_v2 = vmul.f32 %v3523_v33, %v3523_v33 }
 0x3ba   :  { %v1199_v7 = vmul.f32 %v3527_v3, %v3527_v3  ;;  %v1200_v56 = vmul.f32 %v3533_v5, %v3533_v5  ;;  %v3551_v15 = vsub.f32 %v3407_v49, %v3503_v16  ;;  %v1201_v47 = vmul.f32 %v3539_v40, %v3539_v40 }
 0x3bb   :  { %v1227_v11 = vadd.f32 %v1196_v58, %v1195_v51  ;;  %v3557_v17 = vsub.f32 %v3412_v23, %v3503_v16  ;;  %v1202_v30 = vmul.f32 %v3545_v50, %v3545_v50  ;;  %v3563_v54 = vsub.f32 %v3415_v28, %v3503_v16 }
 0x3bc   :  { %v1203_v49 = vmul.f32 %v3551_v15, %v3551_v15  ;;  %v3569_v0 = vsub.f32 %v3419_v8, %v3503_v16  ;;  %v3575_v18 = vsub.f32 %v3423_v55, %v3503_v16  ;;  %v3581_v37 = vsub.f32 %v3428_v48, %v3503_v16 }
 0x3bd   :  { %v1228_v38 = vadd.f32 %v1227_v11, %v1197_v46  ;;  %v1204_v23 = vmul.f32 %v3557_v17, %v3557_v17  ;;  %v1205_v28 = vmul.f32 %v3563_v54, %v3563_v54  ;;  %v3587_v42 = vsub.f32 %v3431_v59, %v3503_v16 }
 0x3be   :  { %v1206_v8 = vmul.f32 %v3569_v0, %v3569_v0  ;;  %v1207_v55 = vmul.f32 %v3575_v18, %v3575_v18  ;;  %v3593_v45 = vsub.f32 %v3435_v53, %v3503_v16  ;;  %v1208_v48 = vmul.f32 %v3581_v37, %v3581_v37 }
 0x3bf   :  { %v1229_v39 = vadd.f32 %v1228_v38, %v1198_v2  ;;  %v3599_v29 = vsub.f32 %v3439_v60, %v3503_v16  ;;  %v1209_v59 = vmul.f32 %v3587_v42, %v3587_v42  ;;  %v3605_v35 = vsub.f32 %v3444_v4, %v3503_v16 }
 0x3c0   :  { %v1210_v53 = vmul.f32 %v3593_v45, %v3593_v45  ;;  %v3611_v58 = vsub.f32 %v3447_v19, %v3503_v16  ;;  %v3617_v11 = vsub.f32 %v3451_v1, %v3503_v16  ;;  %v3623_v38 = vsub.f32 %v3455_v41, %v3503_v16 }
 0x3c1   :  { %v1230_v44 = vadd.f32 %v1229_v39, %v1199_v7  ;;  %v1211_v60 = vmul.f32 %v3599_v29, %v3599_v29  ;;  %v1212_v4 = vmul.f32 %v3605_v35, %v3605_v35  ;;  %v3629_v39 = vsub.f32 %v3460_v13, %v3503_v16 }
 0x3c2   :  { %v1213_v19 = vmul.f32 %v3611_v58, %v3611_v58  ;;  %v1214_v1 = vmul.f32 %v3617_v11, %v3617_v11  ;;  %v1215_v41 = vmul.f32 %v3623_v38, %v3623_v38 }
 0x3c3   :  { %v1231_v14 = vadd.f32 %v1230_v44, %v1200_v56  ;;  %v3635_v44 = vsub.f32 %v3463_v52, %v3503_v16  ;;  %v1216_v13 = vmul.f32 %v3629_v39, %v3629_v39 }
 0x3c5   :  { %v1232_v21 = vadd.f32 %v1231_v14, %v1201_v47  ;;  %v3641_v14 = vsub.f32 %v3467_v25, %v3503_v16  ;;  %v1217_v52 = vmul.f32 %v3635_v44, %v3635_v44 }
 0x3c7   :  { %v1233_v22 = vadd.f32 %v1232_v21, %v1202_v30  ;;  %v3647_v21 = vsub.f32 %v3471_v9, %v3503_v16  ;;  %v1218_v25 = vmul.f32 %v3641_v14, %v3641_v14 }
 0x3c9   :  { %v1234_v34 = vadd.f32 %v1233_v22, %v1203_v49  ;;  %v3653_v22 = vsub.f32 %v3476_v27, %v3503_v16  ;;  %v1219_v9 = vmul.f32 %v3647_v21, %v3647_v21 }
 0x3cb   :  { %v1235_v63 = vadd.f32 %v1234_v34, %v1204_v23  ;;  %v3659_v34 = vsub.f32 %v3479_v32, %v3503_v16  ;;  %v1220_v27 = vmul.f32 %v3653_v22, %v3653_v22 }
 0x3cd   :  { %v1236_v24 = vadd.f32 %v1235_v63, %v1205_v28  ;;  %v3665_v63 = vsub.f32 %v3483_v26, %v3503_v16  ;;  %v1221_v32 = vmul.f32 %v3659_v34, %v3659_v34 }
 0x3cf   :  { %v1237_v36 = vadd.f32 %v1236_v24, %v1206_v8  ;;  %v3671_v24 = vsub.f32 %v3487_v6, %v3503_v16  ;;  %v1222_v26 = vmul.f32 %v3665_v63, %v3665_v63 }
 0x3d1   :  { %v1238_v10 = vadd.f32 %v1237_v36, %v1207_v55  ;;  %v3677_v36 = vsub.f32 %v3492_v12, %v3503_v16  ;;  %v1223_v6 = vmul.f32 %v3671_v24, %v3671_v24 }
 0x3d3   :  { %v1239_v31 = vadd.f32 %v1238_v10, %v1208_v48  ;;  %v3683_v10 = vsub.f32 %v3495_v61, %v3503_v16  ;;  %v1224_v12 = vmul.f32 %v3677_v36, %v3677_v36 }
 0x3d5   :  { %v1240_v51 = vadd.f32 %v1239_v31, %v1209_v59  ;;  %v3689_v31 = vsub.f32 %v3499_v57, %v3503_v16 }
 0x3d7   :  { %v1241_v46 = vadd.f32 %v1240_v51, %v1210_v53  ;;  %v1225_v51 = vmul.f32 %v3683_v10, %v3683_v10  ;;  %v1226_v61 = vmul.f32 %v3689_v31, %v3689_v31 }
 0x3d9   :  { %v1242_v2 = vadd.f32 %v1241_v46, %v1211_v60 }
 0x3db   :  { %v1243_v7 = vadd.f32 %v1242_v2, %v1212_v4 }
 0x3dd   :  { %v1244_v56 = vadd.f32 %v1243_v7, %v1213_v19 }
 0x3df   :  { %v1245_v47 = vadd.f32 %v1244_v56, %v1214_v1 }
 0x3e1   :  { %v1246_v30 = vadd.f32 %v1245_v47, %v1215_v41 }
 0x3e3   :  { %v1247_v49 = vadd.f32 %v1246_v30, %v1216_v13 }
 0x3e5   :  { %v1248_v23 = vadd.f32 %v1247_v49, %v1217_v52 }
 0x3e7   :  { %v1249_v28 = vadd.f32 %v1248_v23, %v1218_v25  ;;  %v3707_v25 = vld [vmem:[#allocation8 + $0x5] ss:$0 sm:$0xff] }
 0x3e9   :  { %v1250_v8 = vadd.f32 %v1249_v28, %v1219_v9 }
 0x3eb   :  { %v1251_v55 = vadd.f32 %v1250_v8, %v1220_v27  ;;  %v3721_v8 = vld [vmem:[#allocation8 + $0x6] ss:$0 sm:$0xff] }
 0x3ed   :  { %v1252_v48 = vadd.f32 %v1251_v55, %v1221_v32 }
 0x3ef   :  { %v1253_v59 = vadd.f32 %v1252_v48, %v1222_v26 }
 0x3f1   :  { %v1254_v53 = vadd.f32 %v1253_v59, %v1223_v6 }
 0x3f3   :  { %v1255_v60 = vadd.f32 %v1254_v53, %v1224_v12 }
 0x3f5   :  { %v1256_v46 = vadd.f32 %v1255_v60, %v1225_v51 }
 0x3f7   :  { %v1257_v4 = vadd.f32 %v1256_v46, %v1226_v61 }
 0x3f9   :  { %v1258_v2 = vrot.slane %v1257_v4, 4 }
 0x3fb   :  { %v1259_v19 = vadd.f32 %v1258_v2, %v1257_v4 }
 0x3fd   :  { %v1260_v7 = vrot.slane %v1259_v19, 2 }
 0x3ff   :  { %v1261_v1 = vadd.f32 %v1260_v7, %v1259_v19 }
 0x401   :  { %v1262_v56 = vrot.slane %v1261_v1, 1 }
 0x403   :  { %v1263_v57 = vadd.f32 %v1262_v56, %v1261_v1 }
 0x405   :  { %v1264_v16 = vmul.f32 0.00390625, %v1263_v57 }
 0x407   :  { %v1267_v41 = vadd.f32 1e-05, %v1264_v16 }
 0x409   :  { %2708 = vrsqrt.f32 %v1267_v41 }
 0x416   :  { %v3697_v47 = vpop.eup %2708 }
 0x417   :  { %v1269_v13 = vmul.f32 %v3697_v47, %v3507_v20  ;;  %v1270_v30 = vmul.f32 %v3697_v47, %v3511_v62  ;;  %v1271_v52 = vmul.f32 %v3697_v47, %v3515_v43  ;;  %v1272_v49 = vmul.f32 %v3697_v47, %v3523_v33 }
 0x418   :  { %v1273_v23 = vmul.f32 %v3697_v47, %v3527_v3  ;;  %v1274_v9 = vmul.f32 %v3697_v47, %v3533_v5  ;;  %v1275_v20 = vmul.f32 %v3697_v47, %v3539_v40  ;;  %v1276_v62 = vmul.f32 %v3697_v47, %v3545_v50 }
 0x419   :  { %v1305_v28 = vmul.f32 %v3707_v25, %v1269_v13  ;;  %v1306_v43 = vmul.f32 %v3707_v25, %v1270_v30  ;;  %v1307_v33 = vmul.f32 %v3707_v25, %v1271_v52  ;;  %v1308_v27 = vmul.f32 %v3707_v25, %v1272_v49 }
 0x41a   :  { %v1277_v3 = vmul.f32 %v3697_v47, %v3551_v15  ;;  %v1278_v5 = vmul.f32 %v3697_v47, %v3557_v17  ;;  %v1309_v40 = vmul.f32 %v3707_v25, %v1273_v23  ;;  %v1310_v50 = vmul.f32 %v3707_v25, %v1274_v9 }
 0x41b   :  { %v1311_v32 = vmul.f32 %v3707_v25, %v1275_v20  ;;  %v1312_v55 = vmul.f32 %v3707_v25, %v1276_v62  ;;  %v1343_v26 = vadd.f32 %v3721_v8, %v1307_v33  ;;  %v1344_v48 = vadd.f32 %v3721_v8, %v1308_v27 }
 0x41c   :  { %v1341_v6 = vadd.f32 %v3721_v8, %v1305_v28  ;;  %v1342_v59 = vadd.f32 %v3721_v8, %v1306_v43  ;;  %v1313_v15 = vmul.f32 %v3707_v25, %v1277_v3  ;;  %v1314_v17 = vmul.f32 %v3707_v25, %v1278_v5 }
 0x41d   :  { %v1345_v12 = vadd.f32 %v3721_v8, %v1309_v40  ;;  %v1346_v53 = vadd.f32 %v3721_v8, %v1310_v50  ;;  %v1375_v51 = vmax.f32 %v1343_v26, 0.0  ;;  %v1376_v60 = vmax.f32 %v1344_v48, 0.0 }
 0x41e   :  { %v1373_v61 = vmax.f32 %v1341_v6, 0.0  ;;  %v1374_v46 = vmax.f32 %v1342_v59, 0.0  ;;  %v1279_v19 = vmul.f32 %v3697_v47, %v3563_v54  ;;  %v1280_v56 = vmul.f32 %v3697_v47, %v3569_v0 }
 0x41f   :  { %v1377_v4 = vmax.f32 %v1345_v12, 0.0  ;;  %v1378_v2 = vmax.f32 %v1346_v53, 0.0  ;;  %v1406_v7 = vpack.c.bf16 %v1376_v60, %v1375_v51  ;;  %v1281_v57 = vmul.f32 %v3697_v47, %v3575_v18 }
 0x420   :  { %v1405_v1 = vpack.c.bf16 %v1374_v46, %v1373_v61  ;;  %v1347_v16 = vadd.f32 %v3721_v8, %v1311_v32  ;;  %v1348_v41 = vadd.f32 %v3721_v8, %v1312_v55  ;;  %v1282_v13 = vmul.f32 %v3697_v47, %v3581_v37 }
 0x421   :  { %v1407_v30 = vpack.c.bf16 %v1378_v2, %v1377_v4  ;;  %v1349_v52 = vadd.f32 %v3721_v8, %v1313_v15  ;;  %v1350_v54 = vadd.f32 %v3721_v8, %v1314_v17  ;;  %v1315_v0 = vmul.f32 %v3707_v25, %v1279_v19 }
 0x422   :  { %2561 = vmatprep.mubr.bf16.mxu1 %v1405_v1  ;;  %v1316_v49 = vmul.f32 %v3707_v25, %v1280_v56  ;;  %v1379_v18 = vmax.f32 %v1347_v16, 0.0  ;;  %v1380_v23 = vmax.f32 %v1348_v41, 0.0  ;;  %v1317_v9 = vmul.f32 %v3707_v25, %v1281_v57 }
 0x423   :  { %2562 = vmatmul.mubr.bf16.vlgmr.msra.gmra.mxu1 %v1406_v7  ;;  %v1318_v20 = vmul.f32 %v3707_v25, %v1282_v13  ;;  %v1381_v62 = vmax.f32 %v1349_v52, 0.0  ;;  %v1382_v37 = vmax.f32 %v1350_v54, 0.0  ;;  %v1283_v28 = vmul.f32 %v3697_v47, %v3587_v42 }
 0x424   :  { %2565 = vmatprep.mubr.bf16.mxu1 %v1407_v30  ;;  %v1284_v43 = vmul.f32 %v3697_v47, %v3593_v45  ;;  %v1285_v33 = vmul.f32 %v3697_v47, %v3599_v29  ;;  %v1408_v27 = vpack.c.bf16 %v1380_v23, %v1379_v18  ;;  %v1351_v3 = vadd.f32 %v3721_v8, %v1315_v0 }
 0x425   :  { %v1352_v5 = vadd.f32 %v3721_v8, %v1316_v49  ;;  %v1286_v40 = vmul.f32 %v3697_v47, %v3605_v35  ;;  %v1409_v50 = vpack.c.bf16 %v1382_v37, %v1381_v62  ;;  %v1353_v32 = vadd.f32 %v3721_v8, %v1317_v9 }
 0x426   :  { %v1354_v55 = vadd.f32 %v3721_v8, %v1318_v20  ;;  %v1319_v42 = vmul.f32 %v3707_v25, %v1283_v28  ;;  %v1320_v45 = vmul.f32 %v3707_v25, %v1284_v43  ;;  %v1383_v29 = vmax.f32 %v1351_v3, 0.0 }
 0x427   :  { %v1384_v26 = vmax.f32 %v1352_v5, 0.0  ;;  %v1321_v48 = vmul.f32 %v3707_v25, %v1285_v33  ;;  %v1322_v6 = vmul.f32 %v3707_v25, %v1286_v40  ;;  %v1385_v59 = vmax.f32 %v1353_v32, 0.0 }
 0x428   :  { %v1386_v15 = vmax.f32 %v1354_v55, 0.0  ;;  %v1287_v35 = vmul.f32 %v3697_v47, %v3611_v58  ;;  %v1288_v17 = vmul.f32 %v3697_v47, %v3617_v11  ;;  %v1289_v12 = vmul.f32 %v3697_v47, %v3623_v38 }
 0x429   :  { %v1410_v53 = vpack.c.bf16 %v1384_v26, %v1383_v29  ;;  %v1355_v51 = vadd.f32 %v3721_v8, %v1319_v42  ;;  %v1356_v60 = vadd.f32 %v3721_v8, %v1320_v45  ;;  %v1290_v61 = vmul.f32 %v3697_v47, %v3629_v39 }
 0x42a   :  { %v1411_v46 = vpack.c.bf16 %v1386_v15, %v1385_v59  ;;  %v1357_v4 = vadd.f32 %v3721_v8, %v1321_v48  ;;  %v1358_v2 = vadd.f32 %v3721_v8, %v1322_v6  ;;  %v1323_v58 = vmul.f32 %v3707_v25, %v1287_v35 }
 0x42b   :  { %2566 = vmatmul.mubr.bf16.gmra.mxu1 %v1408_v27  ;;  %v1324_v11 = vmul.f32 %v3707_v25, %v1288_v17  ;;  %v1387_v38 = vmax.f32 %v1355_v51, 0.0  ;;  %v1388_v19 = vmax.f32 %v1356_v60, 0.0  ;;  %v1325_v7 = vmul.f32 %v3707_v25, %v1289_v12 }
 0x42c   :  { %2569 = vmatprep.mubr.bf16.mxu1 %v1409_v50  ;;  %v1326_v1 = vmul.f32 %v3707_v25, %v1290_v61  ;;  %v1389_v56 = vmax.f32 %v1357_v4, 0.0  ;;  %v1390_v57 = vmax.f32 %v1358_v2, 0.0  ;;  %v1291_v39 = vmul.f32 %v3697_v47, %v3635_v44 }
 0x42d   :  { %v1292_v16 = vmul.f32 %v3697_v47, %v3641_v14  ;;  %v1293_v41 = vmul.f32 %v3697_v47, %v3647_v21  ;;  %v1412_v13 = vpack.c.bf16 %v1388_v19, %v1387_v38  ;;  %v1359_v30 = vadd.f32 %v3721_v8, %v1323_v58 }
 0x42e   :  { %v1360_v52 = vadd.f32 %v3721_v8, %v1324_v11  ;;  %v1294_v54 = vmul.f32 %v3697_v47, %v3653_v22  ;;  %v1413_v0 = vpack.c.bf16 %v1390_v57, %v1389_v56  ;;  %v1361_v49 = vadd.f32 %v3721_v8, %v1325_v7 }
 0x42f   :  { %v1362_v18 = vadd.f32 %v3721_v8, %v1326_v1  ;;  %v1327_v44 = vmul.f32 %v3707_v25, %v1291_v39  ;;  %v1328_v14 = vmul.f32 %v3707_v25, %v1292_v16  ;;  %v1391_v21 = vmax.f32 %v1359_v30, 0.0 }
 0x430   :  { %v1392_v23 = vmax.f32 %v1360_v52, 0.0  ;;  %v1329_v9 = vmul.f32 %v3707_v25, %v1293_v41  ;;  %v1330_v20 = vmul.f32 %v3707_v25, %v1294_v54  ;;  %v1393_v62 = vmax.f32 %v1361_v49, 0.0 }
 0x431   :  { %v1394_v37 = vmax.f32 %v1362_v18, 0.0  ;;  %v1298_v22 = vmul.f32 %v3697_v47, %v3677_v36  ;;  %v1295_v28 = vmul.f32 %v3697_v47, %v3659_v34  ;;  %v1296_v43 = vmul.f32 %v3697_v47, %v3665_v63 }
 0x432   :  { %v1414_v33 = vpack.c.bf16 %v1392_v23, %v1391_v21  ;;  %v1363_v27 = vadd.f32 %v3721_v8, %v1327_v44  ;;  %v1364_v3 = vadd.f32 %v3721_v8, %v1328_v14  ;;  %v1297_v5 = vmul.f32 %v3697_v47, %v3671_v24 }
 0x433   :  { %2570 = vmatmul.mubr.bf16.gmra.mxu1 %v1410_v53  ;;  %v1415_v40 = vpack.c.bf16 %v1394_v37, %v1393_v62  ;;  %v1365_v50 = vadd.f32 %v3721_v8, %v1329_v9  ;;  %v1366_v32 = vadd.f32 %v3721_v8, %v1330_v20  ;;  %v1331_v34 = vmul.f32 %v3707_v25, %v1295_v28 }
 0x434   :  { %2573 = vmatprep.mubr.bf16.mxu1 %v1411_v46  ;;  %v1332_v36 = vmul.f32 %v3707_v25, %v1296_v43  ;;  %v1395_v63 = vmax.f32 %v1363_v27, 0.0  ;;  %v1396_v55 = vmax.f32 %v1364_v3, 0.0  ;;  %v1334_v42 = vmul.f32 %v3707_v25, %v1298_v22 }
 0x435   :  { %v1333_v45 = vmul.f32 %v3707_v25, %v1297_v5  ;;  %v1397_v29 = vmax.f32 %v1365_v50, 0.0  ;;  %v1398_v26 = vmax.f32 %v1366_v32, 0.0  ;;  %v1299_v24 = vmul.f32 %v3697_v47, %v3683_v10 }
 0x436   :  { %v1300_v48 = vmul.f32 %v3697_v47, %v3689_v31  ;;  %v1416_v6 = vpack.c.bf16 %v1396_v55, %v1395_v63  ;;  %v1367_v59 = vadd.f32 %v3721_v8, %v1331_v34  ;;  %v1368_v15 = vadd.f32 %v3721_v8, %v1332_v36 }
 0x437   :  { %v1417_v35 = vpack.c.bf16 %v1398_v26, %v1397_v29  ;;  %v1369_v17 = vadd.f32 %v3721_v8, %v1333_v45  ;;  %v1370_v12 = vadd.f32 %v3721_v8, %v1334_v42  ;;  %v1335_v53 = vmul.f32 %v3707_v25, %v1299_v24 }
 0x438   :  { %v1336_v51 = vmul.f32 %v3707_v25, %v1300_v48  ;;  %v1399_v10 = vmax.f32 %v1367_v59, 0.0  ;;  %v1400_v60 = vmax.f32 %v1368_v15, 0.0  ;;  %v3831_v25 = vld [vmem:[#allocation8 + $0x7] ss:$0 sm:$0xff] }
 0x439   :  { %v1401_v61 = vmax.f32 %v1369_v17, 0.0  ;;  %v1402_v31 = vmax.f32 %v1370_v12, 0.0  ;;  %v1371_v46 = vadd.f32 %v3721_v8, %v1335_v53 }
 0x43a   :  { %v1418_v47 = vpack.c.bf16 %v1400_v60, %v1399_v10  ;;  %v1372_v4 = vadd.f32 %v3721_v8, %v1336_v51 }
 0x43b   :  { %2574 = vmatmul.mubr.bf16.gmra.mxu1 %v1412_v13  ;;  %v1419_v2 = vpack.c.bf16 %v1402_v31, %v1401_v61  ;;  %v1403_v58 = vmax.f32 %v1371_v46, 0.0 }
 0x43c   :  { %2577 = vmatprep.mubr.bf16.mxu1 %v1413_v0  ;;  %v1404_v11 = vmax.f32 %v1372_v4, 0.0 }
 0x43e   :  { %v1420_v38 = vpack.c.bf16 %v1404_v11, %v1403_v58 }
 0x443   :  { %2578 = vmatmul.mubr.bf16.gmra.mxu1 %v1414_v33 }
 0x444   :  { %2581 = vmatprep.mubr.bf16.mxu1 %v1415_v40 }
 0x44b   :  { %2582 = vmatmul.mubr.bf16.gmra.mxu1 %v1416_v6 }
 0x44c   :  { %2585 = vmatprep.mubr.bf16.mxu1 %v1417_v35 }
 0x453   :  { %2586 = vmatmul.mubr.bf16.gmra.mxu1 %v1418_v47 }
 0x454   :  { %2589 = vmatprep.mubr.bf16.mxu1 %v1419_v2 }
 0x45b   :  { %2590 = vmatmul.mubr.bf16.gmra.mxu1 %v1420_v38 }
 0x4e3   :  { %v2563_v19 = vpop.f32.mrf.mxu1 }
 0x4e4   :  { %v3840_v16 = vadd.f32 %v2563_v19, %v3831_v25 }
 0x4e5   :  { %v1525_v7 = vpop.f32.mrf.mxu1 }
 0x4e6   :  { %v3834_v57 = vadd.f32 %v3831_v25, %v1525_v7 }
 0x4e7   :  { %v2564_v1 = vpop.f32.mrf.mxu1 }
 0x4e8   :  { %v3845_v30 = vadd.f32 %v2564_v1, %v3831_v25 }
 0x4e9   :  { %v1528_v56 = vpop.f32.mrf.mxu1 }
 0x4ea   :  { %v3837_v39 = vadd.f32 %v3831_v25, %v1528_v56 }
 0x4eb   :  { %v2567_v8 = vpop.f32.mrf.mxu1 }
 0x4ec   :  { %v1652_v41 = vadd.f32 %v3837_v39, %v3834_v57  ;;  %v3857_v23 = vadd.f32 %v2567_v8, %v3831_v25 }
 0x4ed   :  { %v1541_v13 = vpop.f32.mrf.mxu1 }
 0x4ee   :  { %v1653_v52 = vadd.f32 %v1652_v41, %v3840_v16  ;;  %v3849_v0 = vadd.f32 %v3831_v25, %v1541_v13 }
 0x4ef   :  { %v2568_v54 = vpop.f32.mrf.mxu1 }
 0x4f0   :  { %v1654_v49 = vadd.f32 %v1653_v52, %v3845_v30  ;;  %v3861_v62 = vadd.f32 %v2568_v54, %v3831_v25 }
 0x4f1   :  { %v1544_v18 = vpop.f32.mrf.mxu1 }
 0x4f2   :  { %v1655_v44 = vadd.f32 %v1654_v49, %v3849_v0  ;;  %v3854_v14 = vadd.f32 %v3831_v25, %v1544_v18 }
 0x4f3   :  { %v2571_v21 = vpop.f32.mrf.mxu1 }
 0x4f4   :  { %v1656_v9 = vadd.f32 %v1655_v44, %v3854_v14  ;;  %v3873_v40 = vadd.f32 %v2571_v21, %v3831_v25 }
 0x4f5   :  { %v1557_v20 = vpop.f32.mrf.mxu1 }
 0x4f6   :  { %v1657_v37 = vadd.f32 %v1656_v9, %v3857_v23  ;;  %v3865_v28 = vadd.f32 %v3831_v25, %v1557_v20 }
 0x4f7   :  { %v2572_v22 = vpop.f32.mrf.mxu1 }
 0x4f8   :  { %v1658_v43 = vadd.f32 %v1657_v37, %v3861_v62  ;;  %v3877_v34 = vadd.f32 %v2572_v22, %v3831_v25  ;;  %v2698_v37 = vld [vmem:[#allocation7 + $0xf8] sm:$0xff]  }
 0x4f9   :  { %v1560_v33 = vpop.f32.mrf.mxu1  ;;  %2593 = vmatprep.subr.bf16.mxu0 %v2698_v37 }
 0x4fa   :  { %v1659_v27 = vadd.f32 %v1658_v43, %v3865_v28  ;;  %v3870_v3 = vadd.f32 %v3831_v25, %v1560_v33  ;;  %2594 = vmatpush3.bf16.msra.mxu0 %v2698_v37 }
 0x4fb   :  { %v2575_v5 = vpop.f32.mrf.mxu1 }
 0x4fc   :  { %v1660_v50 = vadd.f32 %v1659_v27, %v3870_v3  ;;  %v3889_v48 = vadd.f32 %v2575_v5, %v3831_v25 }
 0x4fd   :  { %v1573_v32 = vpop.f32.mrf.mxu1 }
 0x4fe   :  { %v1661_v36 = vadd.f32 %v1660_v50, %v3873_v40  ;;  %v3881_v55 = vadd.f32 %v3831_v25, %v1573_v32  ;;  %v2699_v32 = vld [vmem:[#allocation7 + $0xf0] sm:$0xff]  }
 0x4ff   :  { %v2576_v63 = vpop.f32.mrf.mxu1  ;;  %2595 = vmatprep.subr.bf16.mxu0 %v2699_v32 }
 0x500   :  { %v1662_v42 = vadd.f32 %v1661_v36, %v3877_v34  ;;  %v3893_v15 = vadd.f32 %v2576_v63, %v3831_v25  ;;  %2596 = vmatpush3.bf16.msra.mxu0 %v2699_v32 }
 0x501   :  { %v1576_v45 = vpop.f32.mrf.mxu1 }
 0x502   :  { %v1663_v29 = vadd.f32 %v1662_v42, %v3881_v55  ;;  %v3886_v26 = vadd.f32 %v3831_v25, %v1576_v45 }
 0x503   :  { %v2579_v24 = vpop.f32.mrf.mxu1 }
 0x504   :  { %v1664_v6 = vadd.f32 %v1663_v29, %v3886_v26  ;;  %v3905_v31 = vadd.f32 %v2579_v24, %v3831_v25 }
 0x505   :  { %v1589_v59 = vpop.f32.mrf.mxu1 }
 0x506   :  { %v1665_v35 = vadd.f32 %v1664_v6, %v3889_v48  ;;  %v3897_v12 = vadd.f32 %v3831_v25, %v1589_v59  ;;  %v2700_v6 = vld [vmem:[#allocation7 + $0xe8] sm:$0xff]  }
 0x507   :  { %v2580_v17 = vpop.f32.mrf.mxu1  ;;  %2597 = vmatprep.subr.bf16.mxu0 %v2700_v6 }
 0x508   :  { %v1666_v53 = vadd.f32 %v1665_v35, %v3893_v15  ;;  %v3909_v4 = vadd.f32 %v2580_v17, %v3831_v25  ;;  %2598 = vmatpush3.bf16.msra.mxu0 %v2700_v6 }
 0x509   :  { %v1592_v51 = vpop.f32.mrf.mxu1 }
 0x50a   :  { %v1667_v10 = vadd.f32 %v1666_v53, %v3897_v12  ;;  %v3902_v60 = vadd.f32 %v3831_v25, %v1592_v51  ;;  %v2701_v51 = vld [vmem:[#allocation7 + $0xe0] sm:$0xff]  }
 0x50b   :  { %v2583_v61 = vpop.f32.mrf.mxu1  ;;  %2599 = vmatprep.subr.bf16.mxu0 %v2701_v51 }
 0x50c   :  { %v1668_v47 = vadd.f32 %v1667_v10, %v3902_v60  ;;  %v3921_v8 = vadd.f32 %v2583_v61, %v3831_v25  ;;  %2600 = vmatpush3.bf16.msra.mxu0 %v2701_v51 }
 0x50d   :  { %v1605_v46 = vpop.f32.mrf.mxu1 }
 0x50e   :  { %v1669_v2 = vadd.f32 %v1668_v47, %v3905_v31  ;;  %v3913_v11 = vadd.f32 %v3831_v25, %v1605_v46  ;;  %v2702_v47 = vld [vmem:[#allocation7 + $0xd8] sm:$0xff]  }
 0x50f   :  { %v2584_v58 = vpop.f32.mrf.mxu1  ;;  %2601 = vmatprep.subr.bf16.mxu0 %v2702_v47 }
 0x510   :  { %v1670_v38 = vadd.f32 %v1669_v2, %v3909_v4  ;;  %v3925_v52 = vadd.f32 %v2584_v58, %v3831_v25  ;;  %2602 = vmatpush3.bf16.msra.mxu0 %v2702_v47  ;;  %v2703_v58 = vld [vmem:[#allocation7 + $0xd0] sm:$0xff]  }
 0x511   :  { %v1608_v19 = vpop.f32.mrf.mxu1  ;;  %2603 = vmatprep.subr.bf16.mxu0 %v2703_v58 }
 0x512   :  { %v1671_v7 = vadd.f32 %v1670_v38, %v3913_v11  ;;  %v3918_v1 = vadd.f32 %v3831_v25, %v1608_v19  ;;  %v2704_v19 = vld [vmem:[#allocation7 + $0xc8] sm:$0xff]  }
 0x513   :  { %v2587_v56 = vpop.f32.mrf.mxu1 }
 0x514   :  { %v1672_v41 = vadd.f32 %v1671_v7, %v3918_v1  ;;  %v3937_v43 = vadd.f32 %v2587_v56, %v3831_v25  ;;  %2604 = vmatpush3.bf16.msra.mxu0 %v2703_v58  ;;  %v2705_v7 = vld [vmem:[#allocation7 + $0xc0] sm:$0xff]  }
 0x515   :  { %v1621_v13 = vpop.f32.mrf.mxu1  ;;  %2605 = vmatprep.subr.bf16.mxu0 %v2704_v19 }
 0x516   :  { %v1673_v54 = vadd.f32 %v1672_v41, %v3921_v8  ;;  %v3929_v18 = vadd.f32 %v3831_v25, %v1621_v13 }
 0x517   :  { %v2588_v49 = vpop.f32.mrf.mxu1 }
 0x518   :  { %v1674_v44 = vadd.f32 %v1673_v54, %v3925_v52  ;;  %v3941_v5 = vadd.f32 %v2588_v49, %v3831_v25  ;;  %2606 = vmatpush3.bf16.msra.mxu0 %v2704_v19 }
 0x519   :  { %v1624_v21 = vpop.f32.mrf.mxu1  ;;  %2607 = vmatprep.subr.bf16.mxu0 %v2705_v7 }
 0x51a   :  { %v1675_v9 = vadd.f32 %v1674_v44, %v3929_v18  ;;  %v3934_v20 = vadd.f32 %v3831_v25, %v1624_v21 }
 0x51b   :  { %v2591_v22 = vpop.f32.mrf.mxu1 }
 0x51c   :  { %v1676_v33 = vadd.f32 %v1675_v9, %v3934_v20  ;;  %v3953_v59 = vadd.f32 %v2591_v22, %v3831_v25  ;;  %2608 = vmatpush3.bf16.msra.mxu0 %v2705_v7 }
 0x51d   :  { %v1637_v27 = vpop.f32.mrf.mxu1 }
 0x51e   :  { %v1677_v50 = vadd.f32 %v1676_v33, %v3937_v43  ;;  %v3945_v63 = vadd.f32 %v3831_v25, %v1637_v27 }
 0x51f   :  { %v2592_v36 = vpop.f32.mrf.mxu1 }
 0x520   :  { %v1678_v42 = vadd.f32 %v1677_v50, %v3941_v5  ;;  %v3957_v17 = vadd.f32 %v2592_v36, %v3831_v25 }
 0x521   :  { %v1640_v45 = vpop.f32.mrf.mxu1 }
 0x522   :  { %v1679_v29 = vadd.f32 %v1678_v42, %v3945_v63  ;;  %v3950_v24 = vadd.f32 %v3831_v25, %v1640_v45 }
 0x524   :  { %v1680_v35 = vadd.f32 %v1679_v29, %v3950_v24 }
 0x526   :  { %v1681_v53 = vadd.f32 %v1680_v35, %v3953_v59 }
 0x528   :  { %v1682_v10 = vadd.f32 %v1681_v53, %v3957_v17 }
 0x52a   :  { %v1683_v61 = vrot.slane %v1682_v10, 4 }
 0x52c   :  { %v1684_v46 = vadd.f32 %v1683_v61, %v1682_v10 }
 0x52e   :  { %v1685_v2 = vrot.slane %v1684_v46, 2 }
 0x530   :  { %v1686_v38 = vadd.f32 %v1685_v2, %v1684_v46 }
 0x532   :  { %v1687_v25 = vrot.slane %v1686_v38, 1 }
 0x534   :  { %v1688_v56 = vadd.f32 %v1687_v25, %v1686_v38 }
 0x536   :  { %v3961_v41 = vmul.f32 0.00390625, %v1688_v56 }
 0x538   :  { %v3965_v13 = vsub.f32 %v3834_v57, %v3961_v41  ;;  %v3969_v54 = vsub.f32 %v3837_v39, %v3961_v41  ;;  %v3973_v49 = vsub.f32 %v3840_v16, %v3961_v41  ;;  %v3981_v9 = vsub.f32 %v3845_v30, %v3961_v41 }
 0x539   :  { %v3985_v57 = vsub.f32 %v3849_v0, %v3961_v41  ;;  %v3991_v16 = vsub.f32 %v3854_v14, %v3961_v41  ;;  %v3997_v30 = vsub.f32 %v3857_v23, %v3961_v41  ;;  %v4003_v50 = vsub.f32 %v3861_v62, %v3961_v41 }
 0x53a   :  { %v1722_v44 = vmul.f32 %v3965_v13, %v3965_v13  ;;  %v1723_v21 = vmul.f32 %v3969_v54, %v3969_v54  ;;  %v1724_v39 = vmul.f32 %v3973_v49, %v3973_v49  ;;  %v1725_v22 = vmul.f32 %v3981_v9, %v3981_v9 }
 0x53b   :  { %v1726_v0 = vmul.f32 %v3985_v57, %v3985_v57  ;;  %v1727_v14 = vmul.f32 %v3991_v16, %v3991_v16  ;;  %v4009_v36 = vsub.f32 %v3865_v28, %v3961_v41  ;;  %v1728_v23 = vmul.f32 %v3997_v30, %v3997_v30 }
 0x53c   :  { %v1754_v37 = vadd.f32 %v1723_v21, %v1722_v44  ;;  %v4015_v45 = vsub.f32 %v3870_v3, %v3961_v41  ;;  %v1729_v62 = vmul.f32 %v4003_v50, %v4003_v50  ;;  %v4021_v6 = vsub.f32 %v3873_v40, %v3961_v41 }
 0x53d   :  { %v1730_v28 = vmul.f32 %v4009_v36, %v4009_v36  ;;  %v4027_v53 = vsub.f32 %v3877_v34, %v3961_v41  ;;  %v4033_v10 = vsub.f32 %v3881_v55, %v3961_v41  ;;  %v4039_v47 = vsub.f32 %v3886_v26, %v3961_v41 }
 0x53e   :  { %v1755_v33 = vadd.f32 %v1754_v37, %v1724_v39  ;;  %v1731_v3 = vmul.f32 %v4015_v45, %v4015_v45  ;;  %v1732_v40 = vmul.f32 %v4021_v6, %v4021_v6  ;;  %v4045_v2 = vsub.f32 %v3889_v48, %v3961_v41 }
 0x53f   :  { %v1733_v34 = vmul.f32 %v4027_v53, %v4027_v53  ;;  %v1734_v55 = vmul.f32 %v4033_v10, %v4033_v10  ;;  %v4051_v38 = vsub.f32 %v3893_v15, %v3961_v41  ;;  %v1735_v26 = vmul.f32 %v4039_v47, %v4039_v47 }
 0x540   :  { %v1756_v27 = vadd.f32 %v1755_v33, %v1725_v22  ;;  %v4057_v25 = vsub.f32 %v3897_v12, %v3961_v41  ;;  %v1736_v48 = vmul.f32 %v4045_v2, %v4045_v2  ;;  %v4063_v56 = vsub.f32 %v3902_v60, %v3961_v41 }
 0x541   :  { %v1737_v15 = vmul.f32 %v4051_v38, %v4051_v38  ;;  %v4069_v21 = vsub.f32 %v3905_v31, %v3961_v41  ;;  %v4075_v37 = vsub.f32 %v3909_v4, %v3961_v41  ;;  %v4081_v33 = vsub.f32 %v3913_v11, %v3961_v41 }
 0x542   :  { %v1757_v32 = vadd.f32 %v1756_v27, %v1726_v0  ;;  %v1738_v12 = vmul.f32 %v4057_v25, %v4057_v25  ;;  %v1739_v60 = vmul.f32 %v4063_v56, %v4063_v56  ;;  %v4087_v27 = vsub.f32 %v3918_v1, %v3961_v41 }
 0x543   :  { %v1740_v31 = vmul.f32 %v4069_v21, %v4069_v21  ;;  %v1741_v4 = vmul.f32 %v4075_v37, %v4075_v37  ;;  %v1742_v11 = vmul.f32 %v4081_v33, %v4081_v33 }
 0x544   :  { %v1758_v42 = vadd.f32 %v1757_v32, %v1727_v14  ;;  %v4093_v32 = vsub.f32 %v3921_v8, %v3961_v41  ;;  %v1743_v1 = vmul.f32 %v4087_v27, %v4087_v27 }
 0x546   :  { %v1759_v29 = vadd.f32 %v1758_v42, %v1728_v23  ;;  %v4099_v42 = vsub.f32 %v3925_v52, %v3961_v41  ;;  %v1744_v8 = vmul.f32 %v4093_v32, %v4093_v32 }
 0x548   :  { %v1760_v35 = vadd.f32 %v1759_v29, %v1729_v62  ;;  %v4105_v29 = vsub.f32 %v3929_v18, %v3961_v41  ;;  %v1745_v52 = vmul.f32 %v4099_v42, %v4099_v42 }
 0x54a   :  { %v1761_v51 = vadd.f32 %v1760_v35, %v1730_v28  ;;  %v4111_v35 = vsub.f32 %v3934_v20, %v3961_v41  ;;  %v1746_v18 = vmul.f32 %v4105_v29, %v4105_v29 }
 0x54c   :  { %v1762_v61 = vadd.f32 %v1761_v51, %v1731_v3  ;;  %v4117_v51 = vsub.f32 %v3937_v43, %v3961_v41  ;;  %v1747_v20 = vmul.f32 %v4111_v35, %v4111_v35 }
 0x54e   :  { %v1763_v46 = vadd.f32 %v1762_v61, %v1732_v40  ;;  %v4123_v61 = vsub.f32 %v3941_v5, %v3961_v41  ;;  %v1748_v43 = vmul.f32 %v4117_v51, %v4117_v51 }
 0x550   :  { %v1764_v58 = vadd.f32 %v1763_v46, %v1733_v34  ;;  %v4129_v46 = vsub.f32 %v3945_v63, %v3961_v41  ;;  %v1749_v5 = vmul.f32 %v4123_v61, %v4123_v61 }
 0x552   :  { %v1765_v19 = vadd.f32 %v1764_v58, %v1734_v55  ;;  %v4135_v58 = vsub.f32 %v3950_v24, %v3961_v41  ;;  %v1750_v63 = vmul.f32 %v4129_v46, %v4129_v46 }
 0x554   :  { %v1766_v7 = vadd.f32 %v1765_v19, %v1735_v26  ;;  %v4141_v19 = vsub.f32 %v3953_v59, %v3961_v41  ;;  %v1751_v24 = vmul.f32 %v4135_v58, %v4135_v58 }
 0x556   :  { %v1767_v44 = vadd.f32 %v1766_v7, %v1736_v48  ;;  %v4147_v7 = vsub.f32 %v3957_v17, %v3961_v41 }
 0x558   :  { %v1768_v39 = vadd.f32 %v1767_v44, %v1737_v15  ;;  %v1752_v44 = vmul.f32 %v4141_v19, %v4141_v19  ;;  %v1753_v59 = vmul.f32 %v4147_v7, %v4147_v7 }
 0x55a   :  { %v1769_v22 = vadd.f32 %v1768_v39, %v1738_v12 }
 0x55c   :  { %v1770_v0 = vadd.f32 %v1769_v22, %v1739_v60 }
 0x55e   :  { %v1771_v14 = vadd.f32 %v1770_v0, %v1740_v31 }
 0x560   :  { %v1772_v23 = vadd.f32 %v1771_v14, %v1741_v4 }
 0x562   :  { %v1773_v62 = vadd.f32 %v1772_v23, %v1742_v11 }
 0x564   :  { %v1774_v28 = vadd.f32 %v1773_v62, %v1743_v1 }
 0x566   :  { %v1775_v3 = vadd.f32 %v1774_v28, %v1744_v8 }
 0x568   :  { %v1776_v40 = vadd.f32 %v1775_v3, %v1745_v52  ;;  %v4165_v52 = vld [vmem:[#allocation8 + $0x8] ss:$0 sm:$0xff] }
 0x56a   :  { %v1777_v34 = vadd.f32 %v1776_v40, %v1746_v18 }
 0x56c   :  { %v1778_v55 = vadd.f32 %v1777_v34, %v1747_v20  ;;  %v4179_v34 = vld [vmem:[#allocation8 + $0x9] ss:$0 sm:$0xff] }
 0x56e   :  { %v1779_v26 = vadd.f32 %v1778_v55, %v1748_v43 }
 0x570   :  { %v1780_v48 = vadd.f32 %v1779_v26, %v1749_v5 }
 0x572   :  { %v1781_v15 = vadd.f32 %v1780_v48, %v1750_v63 }
 0x574   :  { %v1782_v12 = vadd.f32 %v1781_v15, %v1751_v24 }
 0x576   :  { %v1783_v39 = vadd.f32 %v1782_v12, %v1752_v44 }
 0x578   :  { %v1784_v60 = vadd.f32 %v1783_v39, %v1753_v59 }
 0x57a   :  { %v1785_v22 = vrot.slane %v1784_v60, 4 }
 0x57c   :  { %v1786_v31 = vadd.f32 %v1785_v22, %v1784_v60 }
 0x57e   :  { %v1787_v0 = vrot.slane %v1786_v31, 2 }
 0x580   :  { %v1788_v4 = vadd.f32 %v1787_v0, %v1786_v31 }
 0x582   :  { %v1789_v14 = vrot.slane %v1788_v4, 1 }
 0x584   :  { %v1790_v17 = vadd.f32 %v1789_v14, %v1788_v4 }
 0x586   :  { %v1791_v41 = vmul.f32 0.00390625, %v1790_v17 }
 0x588   :  { %v1794_v11 = vadd.f32 1e-05, %v1791_v41 }
 0x58a   :  { %2710 = vrsqrt.f32 %v1794_v11 }
 0x597   :  { %v4155_v23 = vpop.eup %2710 }
 0x598   :  { %v1796_v1 = vmul.f32 %v4155_v23, %v3965_v13  ;;  %v1797_v62 = vmul.f32 %v4155_v23, %v3969_v54  ;;  %v1798_v8 = vmul.f32 %v4155_v23, %v3973_v49  ;;  %v1799_v28 = vmul.f32 %v4155_v23, %v3981_v9 }
 0x599   :  { %v1800_v3 = vmul.f32 %v4155_v23, %v3985_v57  ;;  %v1801_v18 = vmul.f32 %v4155_v23, %v3991_v16  ;;  %v1802_v13 = vmul.f32 %v4155_v23, %v3997_v30  ;;  %v1803_v54 = vmul.f32 %v4155_v23, %v4003_v50 }
 0x59a   :  { %v1832_v40 = vmul.f32 %v4165_v52, %v1796_v1  ;;  %v1833_v49 = vmul.f32 %v4165_v52, %v1797_v62  ;;  %v1834_v9 = vmul.f32 %v4165_v52, %v1798_v8  ;;  %v1835_v20 = vmul.f32 %v4165_v52, %v1799_v28 }
 0x59b   :  { %v1804_v57 = vmul.f32 %v4155_v23, %v4009_v36  ;;  %v1805_v16 = vmul.f32 %v4155_v23, %v4015_v45  ;;  %v1836_v30 = vmul.f32 %v4165_v52, %v1800_v3  ;;  %v1837_v50 = vmul.f32 %v4165_v52, %v1801_v18 }
 0x59c   :  { %v1838_v43 = vmul.f32 %v4165_v52, %v1802_v13  ;;  %v1839_v55 = vmul.f32 %v4165_v52, %v1803_v54  ;;  %v1870_v5 = vadd.f32 %v4179_v34, %v1834_v9  ;;  %v1871_v26 = vadd.f32 %v4179_v34, %v1835_v20 }
 0x59d   :  { %v1868_v63 = vadd.f32 %v4179_v34, %v1832_v40  ;;  %v1869_v48 = vadd.f32 %v4179_v34, %v1833_v49  ;;  %v1840_v36 = vmul.f32 %v4165_v52, %v1804_v57  ;;  %v1841_v45 = vmul.f32 %v4165_v52, %v1805_v16 }
 0x59e   :  { %v1872_v24 = vadd.f32 %v4179_v34, %v1836_v30  ;;  %v1873_v15 = vadd.f32 %v4179_v34, %v1837_v50  ;;  %v1902_v44 = vmax.f32 %v1870_v5, 0.0  ;;  %v1903_v12 = vmax.f32 %v1871_v26, 0.0 }
 0x59f   :  { %v1900_v59 = vmax.f32 %v1868_v63, 0.0  ;;  %v1901_v39 = vmax.f32 %v1869_v48, 0.0  ;;  %v1806_v31 = vmul.f32 %v4155_v23, %v4021_v6  ;;  %v1807_v14 = vmul.f32 %v4155_v23, %v4027_v53 }
 0x5a0   :  { %v1904_v60 = vmax.f32 %v1872_v24, 0.0  ;;  %v1905_v22 = vmax.f32 %v1873_v15, 0.0  ;;  %v1933_v0 = vpack.c.bf16 %v1903_v12, %v1902_v44  ;;  %v1808_v17 = vmul.f32 %v4155_v23, %v4033_v10 }
 0x5a1   :  { %v1932_v4 = vpack.c.bf16 %v1901_v39, %v1900_v59  ;;  %v1874_v41 = vadd.f32 %v4179_v34, %v1838_v43  ;;  %v1875_v11 = vadd.f32 %v4179_v34, %v1839_v55  ;;  %v1809_v1 = vmul.f32 %v4155_v23, %v4039_v47 }
 0x5a2   :  { %v1934_v62 = vpack.c.bf16 %v1905_v22, %v1904_v60  ;;  %v1876_v8 = vadd.f32 %v4179_v34, %v1840_v36  ;;  %v1877_v6 = vadd.f32 %v4179_v34, %v1841_v45  ;;  %v1842_v53 = vmul.f32 %v4165_v52, %v1806_v31 }
 0x5a3   :  { %2609 = vmatprep.mubr.bf16.mxu0 %v1932_v4  ;;  %v1843_v28 = vmul.f32 %v4165_v52, %v1807_v14  ;;  %v1906_v10 = vmax.f32 %v1874_v41, 0.0  ;;  %v1907_v3 = vmax.f32 %v1875_v11, 0.0  ;;  %v1844_v18 = vmul.f32 %v4165_v52, %v1808_v17 }
 0x5a4   :  { %2610 = vmatmul.mubr.bf16.vlgmr.msra.gmra.mxu0 %v1933_v0  ;;  %v1845_v13 = vmul.f32 %v4165_v52, %v1809_v1  ;;  %v1908_v54 = vmax.f32 %v1876_v8, 0.0  ;;  %v1909_v47 = vmax.f32 %v1877_v6, 0.0  ;;  %v1810_v40 = vmul.f32 %v4155_v23, %v4045_v2 }
 0x5a5   :  { %2613 = vmatprep.mubr.bf16.mxu0 %v1934_v62  ;;  %v1811_v49 = vmul.f32 %v4155_v23, %v4051_v38  ;;  %v1812_v9 = vmul.f32 %v4155_v23, %v4057_v25  ;;  %v1935_v20 = vpack.c.bf16 %v1907_v3, %v1906_v10  ;;  %v1878_v57 = vadd.f32 %v4179_v34, %v1842_v53 }
 0x5a6   :  { %v1879_v16 = vadd.f32 %v4179_v34, %v1843_v28  ;;  %v1813_v30 = vmul.f32 %v4155_v23, %v4063_v56  ;;  %v1936_v50 = vpack.c.bf16 %v1909_v47, %v1908_v54  ;;  %v1880_v43 = vadd.f32 %v4179_v34, %v1844_v18 }
 0x5a7   :  { %v1881_v55 = vadd.f32 %v4179_v34, %v1845_v13  ;;  %v1846_v2 = vmul.f32 %v4165_v52, %v1810_v40  ;;  %v1847_v38 = vmul.f32 %v4165_v52, %v1811_v49  ;;  %v1910_v25 = vmax.f32 %v1878_v57, 0.0 }
 0x5a8   :  { %v1911_v5 = vmax.f32 %v1879_v16, 0.0  ;;  %v1848_v26 = vmul.f32 %v4165_v52, %v1812_v9  ;;  %v1849_v63 = vmul.f32 %v4165_v52, %v1813_v30  ;;  %v1912_v48 = vmax.f32 %v1880_v43, 0.0 }
 0x5a9   :  { %v1913_v36 = vmax.f32 %v1881_v55, 0.0  ;;  %v1814_v56 = vmul.f32 %v4155_v23, %v4069_v21  ;;  %v1815_v45 = vmul.f32 %v4155_v23, %v4075_v37  ;;  %v1816_v24 = vmul.f32 %v4155_v23, %v4081_v33 }
 0x5aa   :  { %v1937_v15 = vpack.c.bf16 %v1911_v5, %v1910_v25  ;;  %v1882_v44 = vadd.f32 %v4179_v34, %v1846_v2  ;;  %v1883_v12 = vadd.f32 %v4179_v34, %v1847_v38  ;;  %v1817_v59 = vmul.f32 %v4155_v23, %v4087_v27 }
 0x5ab   :  { %v1938_v39 = vpack.c.bf16 %v1913_v36, %v1912_v48  ;;  %v1884_v60 = vadd.f32 %v4179_v34, %v1848_v26  ;;  %v1885_v22 = vadd.f32 %v4179_v34, %v1849_v63  ;;  %v1850_v21 = vmul.f32 %v4165_v52, %v1814_v56 }
 0x5ac   :  { %2614 = vmatmul.mubr.bf16.gmra.mxu0 %v1935_v20  ;;  %v1851_v37 = vmul.f32 %v4165_v52, %v1815_v45  ;;  %v1914_v33 = vmax.f32 %v1882_v44, 0.0  ;;  %v1915_v31 = vmax.f32 %v1883_v12, 0.0  ;;  %v1852_v0 = vmul.f32 %v4165_v52, %v1816_v24 }
 0x5ad   :  { %2617 = vmatprep.mubr.bf16.mxu0 %v1936_v50  ;;  %v1853_v4 = vmul.f32 %v4165_v52, %v1817_v59  ;;  %v1916_v14 = vmax.f32 %v1884_v60, 0.0  ;;  %v1917_v17 = vmax.f32 %v1885_v22, 0.0  ;;  %v1818_v27 = vmul.f32 %v4155_v23, %v4093_v32 }
 0x5ae   :  { %v1819_v41 = vmul.f32 %v4155_v23, %v4099_v42  ;;  %v1820_v11 = vmul.f32 %v4155_v23, %v4105_v29  ;;  %v1939_v1 = vpack.c.bf16 %v1915_v31, %v1914_v33  ;;  %v1886_v62 = vadd.f32 %v4179_v34, %v1850_v21  ;;  %v4289_v31 = vld [vmem:[#allocation8 + $0xa] ss:$0 sm:$0xff] }
 0x5af   :  { %v1887_v8 = vadd.f32 %v4179_v34, %v1851_v37  ;;  %v1821_v6 = vmul.f32 %v4155_v23, %v4111_v35  ;;  %v1940_v53 = vpack.c.bf16 %v1917_v17, %v1916_v14  ;;  %v1888_v28 = vadd.f32 %v4179_v34, %v1852_v0 }
 0x5b0   :  { %v1889_v10 = vadd.f32 %v4179_v34, %v1853_v4  ;;  %v1854_v32 = vmul.f32 %v4165_v52, %v1818_v27  ;;  %v1855_v42 = vmul.f32 %v4165_v52, %v1819_v41  ;;  %v1918_v29 = vmax.f32 %v1886_v62, 0.0 }
 0x5b1   :  { %v1919_v3 = vmax.f32 %v1887_v8, 0.0  ;;  %v1856_v18 = vmul.f32 %v4165_v52, %v1820_v11  ;;  %v1857_v13 = vmul.f32 %v4165_v52, %v1821_v6  ;;  %v1920_v54 = vmax.f32 %v1888_v28, 0.0 }
 0x5b2   :  { %v1921_v47 = vmax.f32 %v1889_v10, 0.0  ;;  %v1825_v35 = vmul.f32 %v4155_v23, %v4135_v58  ;;  %v1822_v40 = vmul.f32 %v4155_v23, %v4117_v51  ;;  %v1823_v49 = vmul.f32 %v4155_v23, %v4123_v61 }
 0x5b3   :  { %v1941_v9 = vpack.c.bf16 %v1919_v3, %v1918_v29  ;;  %v1890_v20 = vadd.f32 %v4179_v34, %v1854_v32  ;;  %v1891_v57 = vadd.f32 %v4179_v34, %v1855_v42  ;;  %v1824_v16 = vmul.f32 %v4155_v23, %v4129_v46 }
 0x5b4   :  { %2618 = vmatmul.mubr.bf16.gmra.mxu0 %v1937_v15  ;;  %v1942_v30 = vpack.c.bf16 %v1921_v47, %v1920_v54  ;;  %v1892_v50 = vadd.f32 %v4179_v34, %v1856_v18  ;;  %v1893_v43 = vadd.f32 %v4179_v34, %v1857_v13  ;;  %v1858_v51 = vmul.f32 %v4165_v52, %v1822_v40 }
 0x5b5   :  { %2621 = vmatprep.mubr.bf16.mxu0 %v1938_v39  ;;  %v1859_v58 = vmul.f32 %v4165_v52, %v1823_v49  ;;  %v1922_v61 = vmax.f32 %v1890_v20, 0.0  ;;  %v1923_v55 = vmax.f32 %v1891_v57, 0.0  ;;  %v1861_v2 = vmul.f32 %v4165_v52, %v1825_v35 }
 0x5b6   :  { %v1860_v38 = vmul.f32 %v4165_v52, %v1824_v16  ;;  %v1924_v25 = vmax.f32 %v1892_v50, 0.0  ;;  %v1925_v5 = vmax.f32 %v1893_v43, 0.0  ;;  %v1826_v46 = vmul.f32 %v4155_v23, %v4141_v19 }
 0x5b7   :  { %v1827_v26 = vmul.f32 %v4155_v23, %v4147_v7  ;;  %v1943_v63 = vpack.c.bf16 %v1923_v55, %v1922_v61  ;;  %v1894_v48 = vadd.f32 %v4179_v34, %v1858_v51  ;;  %v1895_v36 = vadd.f32 %v4179_v34, %v1859_v58 }
 0x5b8   :  { %v1944_v56 = vpack.c.bf16 %v1925_v5, %v1924_v25  ;;  %v1896_v45 = vadd.f32 %v4179_v34, %v1860_v38  ;;  %v1897_v24 = vadd.f32 %v4179_v34, %v1861_v2  ;;  %v1862_v15 = vmul.f32 %v4165_v52, %v1826_v46 }
 0x5b9   :  { %v1863_v44 = vmul.f32 %v4165_v52, %v1827_v26  ;;  %v1926_v19 = vmax.f32 %v1894_v48, 0.0  ;;  %v1927_v12 = vmax.f32 %v1895_v36, 0.0 }
 0x5ba   :  { %v1928_v59 = vmax.f32 %v1896_v45, 0.0  ;;  %v1929_v7 = vmax.f32 %v1897_v24, 0.0  ;;  %v1898_v39 = vadd.f32 %v4179_v34, %v1862_v15 }
 0x5bb   :  { %v1945_v23 = vpack.c.bf16 %v1927_v12, %v1926_v19  ;;  %v1899_v60 = vadd.f32 %v4179_v34, %v1863_v44 }
 0x5bc   :  { %2622 = vmatmul.mubr.bf16.gmra.mxu0 %v1939_v1  ;;  %v1946_v22 = vpack.c.bf16 %v1929_v7, %v1928_v59  ;;  %v1930_v21 = vmax.f32 %v1898_v39, 0.0 }
 0x5bd   :  { %2625 = vmatprep.mubr.bf16.mxu0 %v1940_v53  ;;  %v1931_v37 = vmax.f32 %v1899_v60, 0.0 }
 0x5bf   :  { %v1947_v33 = vpack.c.bf16 %v1931_v37, %v1930_v21 }
 0x5c4   :  { %2626 = vmatmul.mubr.bf16.gmra.mxu0 %v1941_v9 }
 0x5c5   :  { %2629 = vmatprep.mubr.bf16.mxu0 %v1942_v30 }
 0x5cc   :  { %2630 = vmatmul.mubr.bf16.gmra.mxu0 %v1943_v63 }
 0x5cd   :  { %2633 = vmatprep.mubr.bf16.mxu0 %v1944_v56 }
 0x5d4   :  { %2634 = vmatmul.mubr.bf16.gmra.mxu0 %v1945_v23 }
 0x5d5   :  { %2637 = vmatprep.mubr.bf16.mxu0 %v1946_v22 }
 0x5dc   :  { %2638 = vmatmul.mubr.bf16.gmra.mxu0 %v1947_v33 }
 0x664   :  { %v2611_v0 = vpop.f32.mrf.mxu0 }
 0x665   :  { %v2061_v52 = vadd.f32 %v2611_v0, %v4289_v31 }
 0x666   :  { %v2052_v4 = vpop.f32.mrf.mxu0 }
 0x667   :  { %2181 = vst [vmem:[#allocation10 + $0x10] sm:$0xff] %v2061_v52  ;;  %v2053_v14 = vadd.f32 %v4289_v31, %v2052_v4 }
 0x668   :  { %v2612_v17 = vpop.f32.mrf.mxu0 }
 0x669   :  { %2179 = vst [vmem:[#allocation10] sm:$0xff] %v2053_v14  ;;  %v2064_v34 = vadd.f32 %v2612_v17, %v4289_v31 }
 0x66a   :  { %v2055_v27 = vpop.f32.mrf.mxu0 }
 0x66b   :  { %2182 = vst [vmem:[#allocation10 + $0x18] sm:$0xff] %v2064_v34  ;;  %v2056_v41 = vadd.f32 %v4289_v31, %v2055_v27 }
 0x66c   :  { %v2615_v11 = vpop.f32.mrf.mxu0 }
 0x66d   :  { %2180 = vst [vmem:[#allocation10 + $0x8] sm:$0xff] %v2056_v41  ;;  %v2077_v1 = vadd.f32 %v2615_v11, %v4289_v31 }
 0x66e   :  { %v2068_v62 = vpop.f32.mrf.mxu0 }
 0x66f   :  { %2185 = vst [vmem:[#allocation10 + $0x30] sm:$0xff] %v2077_v1  ;;  %v2069_v8 = vadd.f32 %v4289_v31, %v2068_v62 }
 0x670   :  { %v2616_v6 = vpop.f32.mrf.mxu0 }
 0x671   :  { %2183 = vst [vmem:[#allocation10 + $0x20] sm:$0xff] %v2069_v8  ;;  %v2080_v53 = vadd.f32 %v2616_v6, %v4289_v31 }
 0x672   :  { %v2071_v28 = vpop.f32.mrf.mxu0 }
 0x673   :  { %2186 = vst [vmem:[#allocation10 + $0x38] sm:$0xff] %v2080_v53  ;;  %v2072_v10 = vadd.f32 %v4289_v31, %v2071_v28 }
 0x674   :  { %v2619_v32 = vpop.f32.mrf.mxu0 }
 0x675   :  { %2184 = vst [vmem:[#allocation10 + $0x28] sm:$0xff] %v2072_v10  ;;  %v2093_v42 = vadd.f32 %v2619_v32, %v4289_v31 }
 0x676   :  { %v2084_v29 = vpop.f32.mrf.mxu0 }
 0x677   :  { %2189 = vst [vmem:[#allocation10 + $0x50] sm:$0xff] %v2093_v42  ;;  %v2085_v3 = vadd.f32 %v4289_v31, %v2084_v29 }
 0x678   :  { %v2620_v18 = vpop.f32.mrf.mxu0 }
 0x679   :  { %2187 = vst [vmem:[#allocation10 + $0x40] sm:$0xff] %v2085_v3  ;;  %v2096_v13 = vadd.f32 %v2620_v18, %v4289_v31 }
 0x67a   :  { %v2087_v54 = vpop.f32.mrf.mxu0 }
 0x67b   :  { %2190 = vst [vmem:[#allocation10 + $0x58] sm:$0xff] %v2096_v13  ;;  %v2088_v47 = vadd.f32 %v4289_v31, %v2087_v54 }
 0x67c   :  { %v2623_v35 = vpop.f32.mrf.mxu0 }
 0x67d   :  { %2188 = vst [vmem:[#allocation10 + $0x48] sm:$0xff] %v2088_v47  ;;  %v2109_v40 = vadd.f32 %v2623_v35, %v4289_v31 }
 0x67e   :  { %v2100_v49 = vpop.f32.mrf.mxu0 }
 0x67f   :  { %2193 = vst [vmem:[#allocation10 + $0x70] sm:$0xff] %v2109_v40  ;;  %v2101_v9 = vadd.f32 %v4289_v31, %v2100_v49 }
 0x680   :  { %v2624_v20 = vpop.f32.mrf.mxu0 }
 0x681   :  { %2191 = vst [vmem:[#allocation10 + $0x60] sm:$0xff] %v2101_v9  ;;  %v2112_v57 = vadd.f32 %v2624_v20, %v4289_v31 }
 0x682   :  { %v2103_v16 = vpop.f32.mrf.mxu0 }
 0x683   :  { %2194 = vst [vmem:[#allocation10 + $0x78] sm:$0xff] %v2112_v57  ;;  %v2104_v30 = vadd.f32 %v4289_v31, %v2103_v16 }
 0x684   :  { %v2627_v50 = vpop.f32.mrf.mxu0 }
 0x685   :  { %2192 = vst [vmem:[#allocation10 + $0x68] sm:$0xff] %v2104_v30  ;;  %v2125_v43 = vadd.f32 %v2627_v50, %v4289_v31 }
 0x686   :  { %v2116_v51 = vpop.f32.mrf.mxu0 }
 0x687   :  { %2197 = vst [vmem:[#allocation10 + $0x90] sm:$0xff] %v2125_v43  ;;  %v2117_v58 = vadd.f32 %v4289_v31, %v2116_v51 }
 0x688   :  { %v2628_v61 = vpop.f32.mrf.mxu0 }
 0x689   :  { %2195 = vst [vmem:[#allocation10 + $0x80] sm:$0xff] %v2117_v58  ;;  %v2128_v55 = vadd.f32 %v2628_v61, %v4289_v31 }
 0x68a   :  { %v2119_v2 = vpop.f32.mrf.mxu0 }
 0x68b   :  { %2198 = vst [vmem:[#allocation10 + $0x98] sm:$0xff] %v2128_v55  ;;  %v2120_v38 = vadd.f32 %v4289_v31, %v2119_v2 }
 0x68c   :  { %v2631_v25 = vpop.f32.mrf.mxu0 }
 0x68d   :  { %2196 = vst [vmem:[#allocation10 + $0x88] sm:$0xff] %v2120_v38  ;;  %v2141_v5 = vadd.f32 %v2631_v25, %v4289_v31 }
 0x68e   :  { %v2132_v46 = vpop.f32.mrf.mxu0 }
 0x68f   :  { %2201 = vst [vmem:[#allocation10 + $0xb0] sm:$0xff] %v2141_v5  ;;  %v2133_v26 = vadd.f32 %v4289_v31, %v2132_v46 }
 0x690   :  { %v2632_v63 = vpop.f32.mrf.mxu0 }
 0x691   :  { %2199 = vst [vmem:[#allocation10 + $0xa0] sm:$0xff] %v2133_v26  ;;  %v2144_v48 = vadd.f32 %v2632_v63, %v4289_v31 }
 0x692   :  { %v2135_v36 = vpop.f32.mrf.mxu0 }
 0x693   :  { %2202 = vst [vmem:[#allocation10 + $0xb8] sm:$0xff] %v2144_v48  ;;  %v2136_v56 = vadd.f32 %v4289_v31, %v2135_v36 }
 0x694   :  { %v2635_v45 = vpop.f32.mrf.mxu0 }
 0x695   :  { %2200 = vst [vmem:[#allocation10 + $0xa8] sm:$0xff] %v2136_v56  ;;  %v2157_v24 = vadd.f32 %v2635_v45, %v4289_v31 }
 0x696   :  { %v2148_v15 = vpop.f32.mrf.mxu0 }
 0x697   :  { %2205 = vst [vmem:[#allocation10 + $0xd0] sm:$0xff] %v2157_v24  ;;  %v2149_v44 = vadd.f32 %v4289_v31, %v2148_v15 }
 0x698   :  { %v2636_v19 = vpop.f32.mrf.mxu0 }
 0x699   :  { %2203 = vst [vmem:[#allocation10 + $0xc0] sm:$0xff] %v2149_v44  ;;  %v2160_v12 = vadd.f32 %v2636_v19, %v4289_v31 }
 0x69a   :  { %v2151_v59 = vpop.f32.mrf.mxu0 }
 0x69b   :  { %2206 = vst [vmem:[#allocation10 + $0xd8] sm:$0xff] %v2160_v12  ;;  %v2152_v7 = vadd.f32 %v4289_v31, %v2151_v59 }
 0x69c   :  { %v2639_v23 = vpop.f32.mrf.mxu0 }
 0x69d   :  { %2204 = vst [vmem:[#allocation10 + $0xc8] sm:$0xff] %v2152_v7  ;;  %v2173_v39 = vadd.f32 %v2639_v23, %v4289_v31 }
 0x69e   :  { %v2164_v60 = vpop.f32.mrf.mxu0 }
 0x69f   :  { %2209 = vst [vmem:[#allocation10 + $0xf0] sm:$0xff] %v2173_v39  ;;  %v2165_v22 = vadd.f32 %v4289_v31, %v2164_v60 }
 0x6a0   :  { %v2640_v21 = vpop.f32.mrf.mxu0 }
 0x6a1   :  { %2207 = vst [vmem:[#allocation10 + $0xe0] sm:$0xff] %v2165_v22  ;;  %v2176_v37 = vadd.f32 %v2640_v21, %v4289_v31 }
 0x6a2   :  { %v2167_v33 = vpop.f32.mrf.mxu0 }
 0x6a3   :  { %2210 = vst [vmem:[#allocation10 + $0xf8] sm:$0xff] %v2176_v37  ;;  %v2168_v0 = vadd.f32 %v4289_v31, %v2167_v33 }
 0x6a5   :  { %2208 = vst [vmem:[#allocation10 + $0xe8] sm:$0xff] %v2168_v0 }
 0x6a6   :  { %2803 = shalt.err (!%p2800_p10)
}
 0x6a7   :  { %2222 = dma.vmem_to_hbm [thread:$0]  %s2217_s3, 4096, %s4333_s4, [#allocation4], %s2824_s25, %s2824_s25, %s2825_s26  }
 0x6a8   :  { %2818 = dma.done.wait [#allocation4], 4096  }
 0x6a9   :  { %2819 = vsyncadd [#allocation4], 4294963200 }
 0x6aa   :  { %2226 = vsyncpa [#allocation3], 1 }
 0x6ab   :  { %2227 = vsyncpa [#allocation6], 1 }
 0x6ac   :  { %2228 = vsyncpa [#allocation9], 1 }
 0x6ad   :  { %2229 = vsyncpa [#allocation4], 1 }

</bundles_post_ra>
